<compile_context>
chip_gen: v6e
topology: v6e:2x2x1
jax: 0.10.0
libtpu: 0.0.40
codegen_flags: <defaults>
</compile_context>

<pallas_src>
import functools

import jax
import jax.numpy as jnp
from jax.experimental import pallas as pl
from jax.experimental.pallas import tpu as pltpu


# ---------------------------------------------------------------------------
# Pallas kernel: fused (X @ W + b) with optional ReLU on one (TM, N) tile.
# ---------------------------------------------------------------------------
def _gemm_bias_act_kernel(x_ref, w_ref, b_ref, o_ref, *, apply_relu):
    # bf16 MXU inputs, f32 accumulation; epilogue stays f32 on the VPU.
    acc = jnp.dot(x_ref[...], w_ref[...], preferred_element_type=jnp.float32)
    acc = acc + b_ref[...]                       # (1, N) broadcasts over rows
    if apply_relu:
        acc = jnp.maximum(acc, 0.0)
    o_ref[...] = acc.astype(o_ref.dtype)


_TM_MAX = 256  # keeps >=2 M-tiles for modest batches (megacore) while amortizing per-step cost


def _round_up(v, m):
    return ((v + m - 1) // m) * m


def pallas_linear(x, w, b2d, *, relu, out_dtype):
    """Fused y = act(x @ w + b).  x:(M,K) float, w:(K,N) bf16 (cached), b2d:(1,N) f32."""
    M, K = x.shape
    N = w.shape[1]
    x = x.astype(jnp.bfloat16)                   # no-op for bf16 activations

    # Load-balanced M tiling: minimal row padding (<= 7 extra rows beyond roundup(M,8)).
    m8 = _round_up(max(M, 1), 8)
    grid_m = -(-m8 // _TM_MAX)                   # ceil
    tm = _round_up(-(-m8 // grid_m), 8)          # <= _TM_MAX, multiple of 8
    mp = tm * grid_m
    if mp != M:
        x = jnp.pad(x, ((0, mp - M), (0, 0)))    # rows only; K/N are never padded

    out = pl.pallas_call(
        functools.partial(_gemm_bias_act_kernel, apply_relu=relu),
        out_shape=jax.ShapeDtypeStruct((mp, N), out_dtype),
        grid=(grid_m,),
        in_specs=[
            pl.BlockSpec((tm, K), lambda i: (i, 0)),   # streamed / double-buffered
            pl.BlockSpec((K, N), lambda i: (0, 0)),    # weight stays VMEM-resident
            pl.BlockSpec((1, N), lambda i: (0, 0)),    # bias stays VMEM-resident
        ],
        out_specs=pl.BlockSpec((tm, N), lambda i: (i, 0)),
        compiler_params=pltpu.CompilerParams(
            dimension_semantics=("parallel",)),        # v7x: M tiles split across both TCs
        cost_estimate=pl.CostEstimate(
            flops=2 * mp * K * N,
            transcendentals=0,
            bytes_accessed=mp * K * 2 + K * N * 2 + N * 4
            + mp * N * jnp.dtype(out_dtype).itemsize),
    )(x, w, b2d)
    return out[:M] if mp != M else out


# ---------------------------------------------------------------------------
# Gather-free patch extraction on channel-last activations.
# ---------------------------------------------------------------------------
def _extract_patches_nhwc(x, k, s):
    """x:(B,H,W,C) -> (B*OH*OW, k*k*C); per-patch feature order is (kh, kw, C)."""
    B, H, W, C = x.shape
    OH = (H - k) // s + 1
    OW = (W - k) // s + 1
    pieces = []
    for dy in range(k):
        for dx in range(k):
            pieces.append(jax.lax.slice(
                x,
                (0, dy, dx, 0),
                (B, dy + (OH - 1) * s + 1, dx + (OW - 1) * s + 1, C),
                (1, s, s, 1)))
    patches = jnp.concatenate(pieces, axis=-1)          # (B, OH, OW, k*k*C)
    return patches.reshape(B * OH * OW, k * k * C), OH, OW


# ---------------------------------------------------------------------------
# Parameters: torch layout (OIHW convs, (in,out) fc), orthogonal init — then a
# one-time conversion to the kernel layout (cached, NOT per forward call).
# ---------------------------------------------------------------------------
def make_torch_params(key, in_channels, feature_dim):
    ks = jax.random.split(key, 4)
    ortho = jax.nn.initializers.orthogonal
    g = 2.0 ** 0.5

    def conv_w(k_, oc, ic, ksz):
        w = ortho(scale=g)(k_, (ic * ksz * ksz, oc), jnp.float32).T
        return w.reshape(oc, ic, ksz, ksz)

    return {
        "c1_w": conv_w(ks[0], 32, in_channels, 8), "c1_b": jnp.zeros((32,), jnp.float32),
        "c2_w": conv_w(ks[1], 64, 32, 4),          "c2_b": jnp.zeros((64,), jnp.float32),
        "c3_w": conv_w(ks[2], 64, 64, 3),          "c3_b": jnp.zeros((64,), jnp.float32),
        "fc_w": ortho(scale=g)(ks[3], (1024, feature_dim), jnp.float32),
        "fc_b": jnp.zeros((feature_dim,), jnp.float32),
    }


def prepare_params(tp):
    """Torch layout -> kernel layout, once at init:
       conv (OC,C,kh,kw) -> (kh*kw*C, OC) bf16 (matches channel-last patch order);
       fc rows permuted from torch (C,H,W) flatten to NHWC (H,W,C) flatten; bias (1,N) f32."""
    def conv_to_khwc(w):
        oc, c, k, _ = w.shape
        return jnp.transpose(w, (2, 3, 1, 0)).reshape(k * k * c, oc).astype(jnp.bfloat16)

    fdim = tp["fc_w"].shape[1]
    fc_hwc = jnp.transpose(tp["fc_w"].reshape(64, 4, 4, fdim),   # rows are (C=64, H=4, W=4)
                           (1, 2, 0, 3)).reshape(1024, fdim).astype(jnp.bfloat16)
    return {
        "c1_w": conv_to_khwc(tp["c1_w"]), "c1_b": tp["c1_b"].reshape(1, -1),
        "c2_w": conv_to_khwc(tp["c2_w"]), "c2_b": tp["c2_b"].reshape(1, -1),
        "c3_w": conv_to_khwc(tp["c3_w"]), "c3_b": tp["c3_b"].reshape(1, -1),
        "fc_w": fc_hwc,                   "fc_b": tp["fc_b"].reshape(1, -1),
    }


# ---------------------------------------------------------------------------
# Encoder.forward: (B, C, 64, 64) f32 -> (B, feature_dim) f32
# ---------------------------------------------------------------------------
def encoder_forward(params, x_nchw):
    B = x_nchw.shape[0]
    # Cast first (halves the bytes the transpose has to move), then the single layout change.
    h = jnp.transpose(x_nchw.astype(jnp.bfloat16), (0, 2, 3, 1))

    p, oh, ow = _extract_patches_nhwc(h, 8, 4)
    h = pallas_linear(p, params["c1_w"], params["c1_b"], relu=True,
                      out_dtype=jnp.bfloat16).reshape(B, oh, ow, 32)

    p, oh, ow = _extract_patches_nhwc(h, 4, 2)
    h = pallas_linear(p, params["c2_w"], params["c2_b"], relu=True,
                      out_dtype=jnp.bfloat16).reshape(B, oh, ow, 64)

    p, oh, ow = _extract_patches_nhwc(h, 3, 1)
    h = pallas_linear(p, params["c3_w"], params["c3_b"], relu=True,
                      out_dtype=jnp.bfloat16).reshape(B, oh * ow * 64)   # NHWC flatten

    return pallas_linear(h, params["fc_w"], params["fc_b"], relu=True,
                         out_dtype=jnp.float32)


# Pure-XLA f32 reference of the original torch module (for a correctness sanity check).
def encoder_reference(tp, x_nchw):
    h = x_nchw
    for w, b, s in ((tp["c1_w"], tp["c1_b"], 4),
                    (tp["c2_w"], tp["c2_b"], 2),
                    (tp["c3_w"], tp["c3_b"], 1)):
        dn = jax.lax.conv_dimension_numbers(h.shape, w.shape, ("NCHW", "OIHW", "NCHW"))
        h = jax.lax.conv_general_dilated(h, w, (s, s), "VALID", dimension_numbers=dn,
                                         precision=jax.lax.Precision.HIGHEST)
        h = jnp.maximum(h + b[None, :, None, None], 0.0)
    h = h.reshape(h.shape[0], -1)                                   # torch (C,H,W) flatten
    return jnp.maximum(h @ tp["fc_w"] + tp["fc_b"], 0.0)


if __name__ == "__main__":
    in_channels, feature_dim, batch = 3, 256, 2
    key = jax.random.PRNGKey(0)
    pkey, xkey = jax.random.split(key)
    torch_params = make_torch_params(pkey, in_channels, feature_dim)
    params = prepare_params(torch_params)
    # 64x64 spatial input is required by Flatten -> Linear(in_features=1024).
    x = jax.random.normal(xkey, (batch, in_channels, 64, 64), dtype=jnp.float32)

    feat = jax.jit(encoder_forward)(params, x)
    jax.block_until_ready(feat)
    assert feat.shape == (batch, feature_dim)
    assert bool(jnp.all(jnp.isfinite(feat)))

    # Sanity check vs the f32 XLA reference (bf16 MXU inputs + f32 accumulation -> small error).
    ref = encoder_reference(torch_params, x)
    assert float(jnp.max(jnp.abs(feat - ref))) < 0.5

    print("KERNEL_OK")
</pallas_src>

<mosaic_0001>
module attributes {stable_mosaic.version = 11 : i64} {
  func.func @_gemm_bias_act_kernel(%arg0: i32, %arg1: memref<232x192xbf16, #tpu.memory_space<vmem>>, %arg2: memref<192x32xbf16, #tpu.memory_space<vmem>>, %arg3: memref<1x32xf32, #tpu.memory_space<vmem>>, %arg4: memref<232x32xbf16, #tpu.memory_space<vmem>>) attributes {dimension_semantics = [#tpu.dimension_semantics<parallel>], iteration_bounds = array<i64: 2>, scalar_prefetch = 0 : i64, scratch_operands = 0 : i64, tpu.core_type = #tpu.core_type<tc>, window_params = [{transform_indices = @transform_0, window_bounds = array<i64: 232, 192>}, {pipeline_mode = #tpu.pipeline_mode<synchronous>, transform_indices = @transform_1, window_bounds = array<i64: 192, 32>}, {pipeline_mode = #tpu.pipeline_mode<synchronous>, transform_indices = @transform_2, window_bounds = array<i64: 1, 32>}, {transform_indices = @transform_3, window_bounds = array<i64: 232, 32>}]} {
    %c0 = arith.constant 0 : index
    %c0_0 = arith.constant 0 : index
    %0 = vector.load %arg1[%c0, %c0_0] : memref<232x192xbf16, #tpu.memory_space<vmem>>, vector<232x192xbf16>
    %c0_1 = arith.constant 0 : index
    %c0_2 = arith.constant 0 : index
    %1 = vector.load %arg2[%c0_1, %c0_2] : memref<192x32xbf16, #tpu.memory_space<vmem>>, vector<192x32xbf16>
    %cst = arith.constant dense<0.000000e+00> : vector<232x32xf32>
    %2 = tpu.matmul %0, %1, %cst {dimension_numbers = #tpu.dot_dimension_numbers<[1], [0], [0], [1], [0, 0, 1, 1], [], []>} : vector<232x192xbf16>, vector<192x32xbf16>, vector<232x32xf32> -> vector<232x32xf32>
    %c0_3 = arith.constant 0 : index
    %c0_4 = arith.constant 0 : index
    %3 = vector.load %arg3[%c0_3, %c0_4] : memref<1x32xf32, #tpu.memory_space<vmem>>, vector<1x32xf32>
    %4 = vector.broadcast %3 : vector<1x32xf32> to vector<232x32xf32>
    %5 = arith.addf %2, %4 : vector<232x32xf32>
    %cst_5 = arith.constant 0.000000e+00 : f32
    %6 = vector.broadcast %cst_5 : f32 to vector<232x32xf32>
    %7 = arith.maximumf %5, %6 : vector<232x32xf32>
    %8 = arith.truncf %7 : vector<232x32xf32> to vector<232x32xbf16>
    %c0_6 = arith.constant 0 : index
    %c0_7 = arith.constant 0 : index
    %9 = vector.load %arg4[%c0_6, %c0_7] : memref<232x32xbf16, #tpu.memory_space<vmem>>, vector<232x32xbf16>
    tpu.vector_store %arg4[%c0_6, %c0_7], %8 {strides = array<i32>} : memref<232x32xbf16, #tpu.memory_space<vmem>>, vector<232x32xbf16>,
    return
  }
  func.func @transform_0(%arg0: i32) -> (i32, i32) {
    %c0_i32 = arith.constant 0 : i32
    %c0_i32_0 = arith.constant 0 : i32
    return %arg0, %c0_i32 : i32, i32
  }
  func.func @transform_1(%arg0: i32) -> (i32, i32) {
    %c0_i32 = arith.constant 0 : i32
    %c0_i32_0 = arith.constant 0 : i32
    %c0_i32_1 = arith.constant 0 : i32
    return %c0_i32, %c0_i32_0 : i32, i32
  }
  func.func @transform_2(%arg0: i32) -> (i32, i32) {
    %c0_i32 = arith.constant 0 : i32
    %c0_i32_0 = arith.constant 0 : i32
    %c0_i32_1 = arith.constant 0 : i32
    return %c0_i32, %c0_i32_0 : i32, i32
  }
  func.func @transform_3(%arg0: i32) -> (i32, i32) {
    %c0_i32 = arith.constant 0 : i32
    %c0_i32_0 = arith.constant 0 : i32
    return %arg0, %c0_i32 : i32, i32
  }
}

module attributes {stable_mosaic.version = 11 : i64} {
  func.func @_gemm_bias_act_kernel(%arg0: i32, %arg1: memref<72x512xbf16, #tpu.memory_space<vmem>>, %arg2: memref<512x64xbf16, #tpu.memory_space<vmem>>, %arg3: memref<1x64xf32, #tpu.memory_space<vmem>>, %arg4: memref<72x64xbf16, #tpu.memory_space<vmem>>) attributes {dimension_semantics = [#tpu.dimension_semantics<parallel>], iteration_bounds = array<i64: 1>, scalar_prefetch = 0 : i64, scratch_operands = 0 : i64, tpu.core_type = #tpu.core_type<tc>, window_params = [{transform_indices = @transform_0, window_bounds = array<i64: 72, 512>}, {pipeline_mode = #tpu.pipeline_mode<synchronous>, transform_indices = @transform_1, window_bounds = array<i64: 512, 64>}, {pipeline_mode = #tpu.pipeline_mode<synchronous>, transform_indices = @transform_2, window_bounds = array<i64: 1, 64>}, {transform_indices = @transform_3, window_bounds = array<i64: 72, 64>}]} {
    %c0 = arith.constant 0 : index
    %c0_0 = arith.constant 0 : index
    %0 = vector.load %arg1[%c0, %c0_0] : memref<72x512xbf16, #tpu.memory_space<vmem>>, vector<72x512xbf16>
    %c0_1 = arith.constant 0 : index
    %c0_2 = arith.constant 0 : index
    %1 = vector.load %arg2[%c0_1, %c0_2] : memref<512x64xbf16, #tpu.memory_space<vmem>>, vector<512x64xbf16>
    %cst = arith.constant dense<0.000000e+00> : vector<72x64xf32>
    %2 = tpu.matmul %0, %1, %cst {dimension_numbers = #tpu.dot_dimension_numbers<[1], [0], [0], [1], [0, 0, 1, 1], [], []>} : vector<72x512xbf16>, vector<512x64xbf16>, vector<72x64xf32> -> vector<72x64xf32>
    %c0_3 = arith.constant 0 : index
    %c0_4 = arith.constant 0 : index
    %3 = vector.load %arg3[%c0_3, %c0_4] : memref<1x64xf32, #tpu.memory_space<vmem>>, vector<1x64xf32>
    %4 = vector.broadcast %3 : vector<1x64xf32> to vector<72x64xf32>
    %5 = arith.addf %2, %4 : vector<72x64xf32>
    %cst_5 = arith.constant 0.000000e+00 : f32
    %6 = vector.broadcast %cst_5 : f32 to vector<72x64xf32>
    %7 = arith.maximumf %5, %6 : vector<72x64xf32>
    %8 = arith.truncf %7 : vector<72x64xf32> to vector<72x64xbf16>
    %c0_6 = arith.constant 0 : index
    %c0_7 = arith.constant 0 : index
    %9 = vector.load %arg4[%c0_6, %c0_7] : memref<72x64xbf16, #tpu.memory_space<vmem>>, vector<72x64xbf16>
    tpu.vector_store %arg4[%c0_6, %c0_7], %8 {strides = array<i32>} : memref<72x64xbf16, #tpu.memory_space<vmem>>, vector<72x64xbf16>,
    return
  }
  func.func @transform_0(%arg0: i32) -> (i32, i32) {
    %c0_i32 = arith.constant 0 : i32
    %c0_i32_0 = arith.constant 0 : i32
    return %arg0, %c0_i32 : i32, i32
  }
  func.func @transform_1(%arg0: i32) -> (i32, i32) {
    %c0_i32 = arith.constant 0 : i32
    %c0_i32_0 = arith.constant 0 : i32
    %c0_i32_1 = arith.constant 0 : i32
    return %c0_i32, %c0_i32_0 : i32, i32
  }
  func.func @transform_2(%arg0: i32) -> (i32, i32) {
    %c0_i32 = arith.constant 0 : i32
    %c0_i32_0 = arith.constant 0 : i32
    %c0_i32_1 = arith.constant 0 : i32
    return %c0_i32, %c0_i32_0 : i32, i32
  }
  func.func @transform_3(%arg0: i32) -> (i32, i32) {
    %c0_i32 = arith.constant 0 : i32
    %c0_i32_0 = arith.constant 0 : i32
    return %arg0, %c0_i32 : i32, i32
  }
}

module attributes {stable_mosaic.version = 11 : i64} {
  func.func @_gemm_bias_act_kernel(%arg0: i32, %arg1: memref<32x576xbf16, #tpu.memory_space<vmem>>, %arg2: memref<576x64xbf16, #tpu.memory_space<vmem>>, %arg3: memref<1x64xf32, #tpu.memory_space<vmem>>, %arg4: memref<32x64xbf16, #tpu.memory_space<vmem>>) attributes {dimension_semantics = [#tpu.dimension_semantics<parallel>], iteration_bounds = array<i64: 1>, scalar_prefetch = 0 : i64, scratch_operands = 0 : i64, tpu.core_type = #tpu.core_type<tc>, window_params = [{transform_indices = @transform_0, window_bounds = array<i64: 32, 576>}, {pipeline_mode = #tpu.pipeline_mode<synchronous>, transform_indices = @transform_1, window_bounds = array<i64: 576, 64>}, {pipeline_mode = #tpu.pipeline_mode<synchronous>, transform_indices = @transform_2, window_bounds = array<i64: 1, 64>}, {transform_indices = @transform_3, window_bounds = array<i64: 32, 64>}]} {
    %c0 = arith.constant 0 : index
    %c0_0 = arith.constant 0 : index
    %0 = vector.load %arg1[%c0, %c0_0] : memref<32x576xbf16, #tpu.memory_space<vmem>>, vector<32x576xbf16>
    %c0_1 = arith.constant 0 : index
    %c0_2 = arith.constant 0 : index
    %1 = vector.load %arg2[%c0_1, %c0_2] : memref<576x64xbf16, #tpu.memory_space<vmem>>, vector<576x64xbf16>
    %cst = arith.constant dense<0.000000e+00> : vector<32x64xf32>
    %2 = tpu.matmul %0, %1, %cst {dimension_numbers = #tpu.dot_dimension_numbers<[1], [0], [0], [1], [0, 0, 1, 1], [], []>} : vector<32x576xbf16>, vector<576x64xbf16>, vector<32x64xf32> -> vector<32x64xf32>
    %c0_3 = arith.constant 0 : index
    %c0_4 = arith.constant 0 : index
    %3 = vector.load %arg3[%c0_3, %c0_4] : memref<1x64xf32, #tpu.memory_space<vmem>>, vector<1x64xf32>
    %4 = vector.broadcast %3 : vector<1x64xf32> to vector<32x64xf32>
    %5 = arith.addf %2, %4 : vector<32x64xf32>
    %cst_5 = arith.constant 0.000000e+00 : f32
    %6 = vector.broadcast %cst_5 : f32 to vector<32x64xf32>
    %7 = arith.maximumf %5, %6 : vector<32x64xf32>
    %8 = arith.truncf %7 : vector<32x64xf32> to vector<32x64xbf16>
    %c0_6 = arith.constant 0 : index
    %c0_7 = arith.constant 0 : index
    %9 = vector.load %arg4[%c0_6, %c0_7] : memref<32x64xbf16, #tpu.memory_space<vmem>>, vector<32x64xbf16>
    tpu.vector_store %arg4[%c0_6, %c0_7], %8 {strides = array<i32>} : memref<32x64xbf16, #tpu.memory_space<vmem>>, vector<32x64xbf16>,
    return
  }
  func.func @transform_0(%arg0: i32) -> (i32, i32) {
    %c0_i32 = arith.constant 0 : i32
    %c0_i32_0 = arith.constant 0 : i32
    return %arg0, %c0_i32 : i32, i32
  }
  func.func @transform_1(%arg0: i32) -> (i32, i32) {
    %c0_i32 = arith.constant 0 : i32
    %c0_i32_0 = arith.constant 0 : i32
    %c0_i32_1 = arith.constant 0 : i32
    return %c0_i32, %c0_i32_0 : i32, i32
  }
  func.func @transform_2(%arg0: i32) -> (i32, i32) {
    %c0_i32 = arith.constant 0 : i32
    %c0_i32_0 = arith.constant 0 : i32
    %c0_i32_1 = arith.constant 0 : i32
    return %c0_i32, %c0_i32_0 : i32, i32
  }
  func.func @transform_3(%arg0: i32) -> (i32, i32) {
    %c0_i32 = arith.constant 0 : i32
    %c0_i32_0 = arith.constant 0 : i32
    return %arg0, %c0_i32 : i32, i32
  }
}

module attributes {stable_mosaic.version = 11 : i64} {
  func.func @_gemm_bias_act_kernel(%arg0: i32, %arg1: memref<8x1024xbf16, #tpu.memory_space<vmem>>, %arg2: memref<1024x256xbf16, #tpu.memory_space<vmem>>, %arg3: memref<1x256xf32, #tpu.memory_space<vmem>>, %arg4: memref<8x256xf32, #tpu.memory_space<vmem>>) attributes {dimension_semantics = [#tpu.dimension_semantics<parallel>], iteration_bounds = array<i64: 1>, scalar_prefetch = 0 : i64, scratch_operands = 0 : i64, tpu.core_type = #tpu.core_type<tc>, window_params = [{transform_indices = @transform_0, window_bounds = array<i64: 8, 1024>}, {pipeline_mode = #tpu.pipeline_mode<synchronous>, transform_indices = @transform_1, window_bounds = array<i64: 1024, 256>}, {pipeline_mode = #tpu.pipeline_mode<synchronous>, transform_indices = @transform_2, window_bounds = array<i64: 1, 256>}, {transform_indices = @transform_3, window_bounds = array<i64: 8, 256>}]} {
    %c0 = arith.constant 0 : index
    %c0_0 = arith.constant 0 : index
    %0 = vector.load %arg1[%c0, %c0_0] : memref<8x1024xbf16, #tpu.memory_space<vmem>>, vector<8x1024xbf16>
    %c0_1 = arith.constant 0 : index
    %c0_2 = arith.constant 0 : index
    %1 = vector.load %arg2[%c0_1, %c0_2] : memref<1024x256xbf16, #tpu.memory_space<vmem>>, vector<1024x256xbf16>
    %cst = arith.constant dense<0.000000e+00> : vector<8x256xf32>
    %2 = tpu.matmul %0, %1, %cst {dimension_numbers = #tpu.dot_dimension_numbers<[1], [0], [0], [1], [0, 0, 1, 1], [], []>} : vector<8x1024xbf16>, vector<1024x256xbf16>, vector<8x256xf32> -> vector<8x256xf32>
    %c0_3 = arith.constant 0 : index
    %c0_4 = arith.constant 0 : index
    %3 = vector.load %arg3[%c0_3, %c0_4] : memref<1x256xf32, #tpu.memory_space<vmem>>, vector<1x256xf32>
    %4 = vector.broadcast %3 : vector<1x256xf32> to vector<8x256xf32>
    %5 = arith.addf %2, %4 : vector<8x256xf32>
    %cst_5 = arith.constant 0.000000e+00 : f32
    %6 = vector.broadcast %cst_5 : f32 to vector<8x256xf32>
    %7 = arith.maximumf %5, %6 : vector<8x256xf32>
    %c0_6 = arith.constant 0 : index
    %c0_7 = arith.constant 0 : index
    %8 = vector.load %arg4[%c0_6, %c0_7] : memref<8x256xf32, #tpu.memory_space<vmem>>, vector<8x256xf32>
    tpu.vector_store %arg4[%c0_6, %c0_7], %7 {strides = array<i32>} : memref<8x256xf32, #tpu.memory_space<vmem>>, vector<8x256xf32>,
    return
  }
  func.func @transform_0(%arg0: i32) -> (i32, i32) {
    %c0_i32 = arith.constant 0 : i32
    %c0_i32_0 = arith.constant 0 : i32
    return %arg0, %c0_i32 : i32, i32
  }
  func.func @transform_1(%arg0: i32) -> (i32, i32) {
    %c0_i32 = arith.constant 0 : i32
    %c0_i32_0 = arith.constant 0 : i32
    %c0_i32_1 = arith.constant 0 : i32
    return %c0_i32, %c0_i32_0 : i32, i32
  }
  func.func @transform_2(%arg0: i32) -> (i32, i32) {
    %c0_i32 = arith.constant 0 : i32
    %c0_i32_0 = arith.constant 0 : i32
    %c0_i32_1 = arith.constant 0 : i32
    return %c0_i32, %c0_i32_0 : i32, i32
  }
  func.func @transform_3(%arg0: i32) -> (i32, i32) {
    %c0_i32 = arith.constant 0 : i32
    %c0_i32_0 = arith.constant 0 : i32
    return %arg0, %c0_i32 : i32, i32
  }
}

</mosaic_0001>

<bundles_post_ra>
// kernel: encoder_forward.4
= control target key start
LH: loop header
LB: loop body
LE: loop exit
PB: predicated region body
PF: predicated region fallthrough
CT: control target
= control target key end

     0   :  { %s1117_s12 = smov 0   ;;  %s1338_s0 = inlined_call_operand.vmem [shape: bf16[464,192], index: 0, kind: input, shape index: {}]   ;;  %s1339_s1 = inlined_call_operand.vmem [shape: bf16[192,32], index: 1, kind: input, shape index: {}]   ;;  %s1340_s2 = inlined_call_operand.vmem [shape: f32[1,32], index: 2, kind: input, shape index: {}]   ;;  %s1341_s3 = inlined_call_operand.vmem [shape: bf16[464,32], index: 3, kind: output, shape index: {}]  }
   0x1 LB: > { %s872_s13 = sadd.s32 4294967295, %s1094_s12   ;;  %p876_p0 = scmp.ge.s32.totalorder %s1094_s12, 1  ;;  %s1094_s12 = sphi %s1117_s12, %s13_s12  }
   0x2   : > { %p139_p1 = scmp.lt.s32.totalorder %s1094_s12, 3 }
   0x4   : > { %p140_p2 = pnand %p876_p0, %p139_p1 }
   0x5   : > { %s164_s16 = smul.u32 (!%p140_p2), 29, %s872_s13 }
   0x6   : > { %143 = sbr.rel (%p140_p2) target bundleno = 320 (0x140), region = 32 }
   0x7   : > { %p165_p3 = scmp.lt.s32.totalorder (!%p140_p2), %s164_s16, 57 }
   0xb   : > { %v1032_v0 = vld [vmem:[%s1339_s1 + $0x38] sm:$0xff]   ;;  %v1096_v1 = vmov 0   ;;  %v1033_v2 = vld [vmem:[%s1339_s1 + $0x30] sm:$0xff]   ;;  %s1343_s16 = smov (!%p165_p3, %s164_s16), 57  ;;  %v1034_v3 = vld [vmem:[%s1339_s1 + $0x28] sm:$0xff]   ;;  %vm442_vm0 = vcmask 523264  }
   0xc   : > { %488 = vmatprep.subr.bf16.mxu0 %v1096_v1  ;;  %999 = vmatprep.subr.bf16.mxu1 %v1096_v1  ;;  %s969_s21 = sshll.u32 %s1343_s16, 3  ;;  %v1035_v4 = vld [vmem:[%s1339_s1 + $0x20] sm:$0xff]   ;;  %v1036_v6 = vld [vmem:[%s1339_s1 + $0x18] sm:$0xff]   ;;  %v1037_v8 = vld [vmem:[%s1339_s1 + $0x10] sm:$0xff]   ;;  %s879_s20 = sshll.u32 %s1343_s16, 2  ;;  %vm786_vm1 = vcmask 257024  }
   0xd   : > { %489 = vmatpush1.bf16.msra.mxu0 %v1032_v0  ;;  %1011 = vmatpush1.bf16.msra.mxu1 %v1032_v0  ;;  %s1149_s26 = scalar_lea.vmem %s1338_s0, %s969_s21  ;;  %v1038_v9 = vld [vmem:[%s1339_s1 + $0x8] sm:$0xff]   ;;  %v1039_v10 = vld [vmem:[%s1339_s1] sm:$0xff]   ;;  %v1040_v11 = vld [vmem:[%s1339_s1 + $0x58] sm:$0xff]   ;;  %s1248_s23 = scalar_lea.vmem %s1341_s3, %s879_s20 }
   0xe   : > { %490 = vmatprep.subr.bf16.mxu0 %v1096_v1  ;;  %1000 = vmatprep.subr.bf16.mxu1 %v1096_v1  ;;  %v1046_v5 = vld [vmem:[%s1149_s26 + $0x4] ss:$8 sps:$4 sm:$0xff]   ;;  %v1041_v12 = vld [vmem:[%s1339_s1 + $0x50] sm:$0xff]   ;;  %v1044_v15 = vld [vmem:[%s1149_s26] ss:$8 sps:$4 sm:$0xff]  }
   0xf   : > { %v1049_v7 = vld [vmem:[%s1149_s26 + $0x84] ss:$8 sps:$4 sm:$0xff]   ;;  %923 = vmatprep.mubr.msk.bf16.mxu0 %vm442_vm0, %v1046_v5  ;;  %v1047_v16 = vld [vmem:[%s1149_s26 + $0x80] ss:$8 sps:$4 sm:$0xff]   ;;  %v1050_v17 = vld [vmem:[%s1149_s26 + $0x14] ss:$8 sps:$4 sm:$0xff]  }
  0x10   : > { %931 = vmatprep.mubr.msk.bf16.mxu1 %vm442_vm0, %v1049_v7  ;;  %v1042_v13 = vld [vmem:[%s1339_s1 + $0x48] sm:$0xff]   ;;  %v1043_v14 = vld [vmem:[%s1339_s1 + $0x40] sm:$0xff]   ;;  %v1053_v18 = vld [vmem:[%s1149_s26 + $0x94] ss:$8 sps:$4 sm:$0xff]  }
  0x11   : > { %491 = vmatpush1.bf16.msra.mxu0 %v1033_v2  ;;  %1012 = vmatpush1.bf16.msra.mxu1 %v1033_v2  ;;  %v1052_v19 = vld [vmem:[%s1149_s26 + $0x10] ss:$8 sps:$4 sm:$0xff]   ;;  %v1056_v21 = vld [vmem:[%s1149_s26 + $0x24] ss:$8 sps:$4 sm:$0xff]   ;;  %v1058_v23 = vld [vmem:[%s1149_s26 + $0x20] ss:$8 sps:$4 sm:$0xff]  }
  0x12   : > { %492 = vmatprep.subr.bf16.mxu0 %v1096_v1  ;;  %1001 = vmatprep.subr.bf16.mxu1 %v1096_v1  ;;  %v1055_v20 = vld [vmem:[%s1149_s26 + $0x90] ss:$8 sps:$4 sm:$0xff]   ;;  %v1059_v22 = vld [vmem:[%s1149_s26 + $0xa4] ss:$8 sps:$4 sm:$0xff]   ;;  %v1061_v24 = vld [vmem:[%s1149_s26 + $0xa0] ss:$8 sps:$4 sm:$0xff]  }
  0x13   : > { %v1062_v25 = vld [vmem:[%s1149_s26 + $0x34] ss:$8 sps:$4 sm:$0xff]   ;;  %v1064_v27 = vld [vmem:[%s1149_s26 + $0x30] ss:$8 sps:$4 sm:$0xff]   ;;  %v1068_v29 = vld [vmem:[%s1149_s26 + $0x44] ss:$8 sps:$4 sm:$0xff]  }
  0x14   : > { %v1065_v26 = vld [vmem:[%s1149_s26 + $0xb4] ss:$8 sps:$4 sm:$0xff]   ;;  %v1067_v28 = vld [vmem:[%s1149_s26 + $0xb0] ss:$8 sps:$4 sm:$0xff]   ;;  %v1071_v30 = vld [vmem:[%s1149_s26 + $0xc4] ss:$8 sps:$4 sm:$0xff]  }
  0x15   : > { %493 = vmatpush1.bf16.msra.mxu0 %v1034_v3  ;;  %1013 = vmatpush1.bf16.msra.mxu1 %v1034_v3  ;;  %v1070_v31 = vld [vmem:[%s1149_s26 + $0x40] ss:$8 sps:$4 sm:$0xff]   ;;  %v1074_v33 = vld [vmem:[%s1149_s26 + $0x54] ss:$8 sps:$4 sm:$0xff]   ;;  %v1076_v36 = vld [vmem:[%s1149_s26 + $0x50] ss:$8 sps:$4 sm:$0xff]  }
  0x16   : > { %494 = vmatprep.subr.bf16.mxu0 %v1096_v1  ;;  %1002 = vmatprep.subr.bf16.mxu1 %v1096_v1  ;;  %v1073_v32 = vld [vmem:[%s1149_s26 + $0xc0] ss:$8 sps:$4 sm:$0xff]   ;;  %v1077_v34 = vld [vmem:[%s1149_s26 + $0xd4] ss:$8 sps:$4 sm:$0xff]   ;;  %v1079_v37 = vld [vmem:[%s1149_s26 + $0xd0] ss:$8 sps:$4 sm:$0xff]  }
  0x17   : > { %v206_v35 = vld [vmem:[%s1149_s26 + $0xe0] sm:$0xff]  ;;  %v1085_v42 = vld [vmem:[%s1149_s26 + $0x74] ss:$8 sps:$4 sm:$0xff]   ;;  %v1087_v43 = vld [vmem:[%s1149_s26 + $0x70] ss:$8 sps:$4 sm:$0xff]  }
  0x18   : > { %v1080_v38 = vld [vmem:[%s1149_s26 + $0x64] ss:$8 sps:$4 sm:$0xff]   ;;  %v910_v39 = vcombine.high %v206_v35, %v206_v35  ;;  %v1082_v40 = vld [vmem:[%s1149_s26 + $0x60] ss:$8 sps:$4 sm:$0xff]   ;;  %v909_v41 = vcombine.low %v206_v35, %v206_v35 }
  0x19   : > { %495 = vmatpush1.bf16.msra.mxu0 %v1035_v4  ;;  %1014 = vmatpush1.bf16.msra.mxu1 %v1035_v4  ;;  %v1240_v44 = vld [vmem:[%s1340_s2] ss:$0 sm:$0xff] }
  0x1a   : > { %496 = vmatprep.subr.bf16.mxu0 %v1096_v1  ;;  %1003 = vmatprep.subr.bf16.mxu1 %v1096_v1 }
  0x1d   : > { %497 = vmatpush1.bf16.msra.mxu0 %v1036_v6  ;;  %1015 = vmatpush1.bf16.msra.mxu1 %v1036_v6 }
  0x1e   : > { %498 = vmatprep.subr.bf16.mxu0 %v1096_v1  ;;  %1004 = vmatprep.subr.bf16.mxu1 %v1096_v1 }
  0x21   : > { %499 = vmatpush1.bf16.msra.mxu0 %v1037_v8  ;;  %1016 = vmatpush1.bf16.msra.mxu1 %v1037_v8 }
  0x22   : > { %500 = vmatprep.subr.bf16.mxu0 %v1096_v1  ;;  %1005 = vmatprep.subr.bf16.mxu1 %v1096_v1 }
  0x25   : > { %501 = vmatpush1.bf16.msra.mxu0 %v1038_v9  ;;  %1017 = vmatpush1.bf16.msra.mxu1 %v1038_v9 }
  0x26   : > { %502 = vmatprep.subr.bf16.mxu0 %v1096_v1  ;;  %1006 = vmatprep.subr.bf16.mxu1 %v1096_v1 }
  0x29   : > { %503 = vmatpush1.bf16.msra.mxu0 %v1039_v10  ;;  %1018 = vmatpush1.bf16.msra.mxu1 %v1039_v10 }
  0x2a   : > { %512 = vmatprep.subr.bf16.mxu0 %v1096_v1  ;;  %1007 = vmatprep.subr.bf16.mxu1 %v1096_v1 }
  0x2d   : > { %513 = vmatpush2.bf16.msra.mxu0 %v1040_v11  ;;  %1019 = vmatpush2.bf16.msra.mxu1 %v1040_v11 }
  0x2e   : > { %514 = vmatprep.subr.bf16.mxu0 %v1096_v1  ;;  %1008 = vmatprep.subr.bf16.mxu1 %v1096_v1 }
  0x31   : > { %515 = vmatpush2.bf16.msra.mxu0 %v1041_v12  ;;  %1020 = vmatpush2.bf16.msra.mxu1 %v1041_v12 }
  0x32   : > { %516 = vmatprep.subr.bf16.mxu0 %v1096_v1  ;;  %1009 = vmatprep.subr.bf16.mxu1 %v1096_v1 }
  0x35   : > { %517 = vmatpush2.bf16.msra.mxu0 %v1042_v13  ;;  %1021 = vmatpush2.bf16.msra.mxu1 %v1042_v13 }
  0x36   : > { %518 = vmatprep.subr.bf16.mxu0 %v1096_v1  ;;  %1010 = vmatprep.subr.bf16.mxu1 %v1096_v1 }
  0x39   : > { %519 = vmatpush2.bf16.msra.mxu0 %v1043_v14  ;;  %1022 = vmatpush2.bf16.msra.mxu1 %v1043_v14 }
  0x3c   : > { %521 = vmatmul.mubr.bf16.vlgmr.msra.gmra.mxu0 %v1044_v15  ;;  %585 = vmatmul.mubr.bf16.vlgmr.msra.gmra.mxu1 %v1047_v16 }
  0x3d   : > { %924 = vmatprep.mubr.msk.bf16.mxu0 %vm442_vm0, %v1050_v17  ;;  %932 = vmatprep.mubr.msk.bf16.mxu1 %vm442_vm0, %v1053_v18 }
  0x44   : > { %529 = vmatmul.mubr.bf16.gmra.mxu0 %v1052_v19  ;;  %593 = vmatmul.mubr.bf16.gmra.mxu1 %v1055_v20 }
  0x45   : > { %925 = vmatprep.mubr.msk.bf16.mxu0 %vm442_vm0, %v1056_v21  ;;  %933 = vmatprep.mubr.msk.bf16.mxu1 %vm442_vm0, %v1059_v22 }
  0x4c   : > { %537 = vmatmul.mubr.bf16.gmra.mxu0 %v1058_v23  ;;  %601 = vmatmul.mubr.bf16.gmra.mxu1 %v1061_v24 }
  0x4d   : > { %926 = vmatprep.mubr.msk.bf16.mxu0 %vm442_vm0, %v1062_v25  ;;  %934 = vmatprep.mubr.msk.bf16.mxu1 %vm442_vm0, %v1065_v26 }
  0x54   : > { %545 = vmatmul.mubr.bf16.gmra.mxu0 %v1064_v27  ;;  %609 = vmatmul.mubr.bf16.gmra.mxu1 %v1067_v28 }
  0x55   : > { %927 = vmatprep.mubr.msk.bf16.mxu0 %vm442_vm0, %v1068_v29  ;;  %935 = vmatprep.mubr.msk.bf16.mxu1 %vm442_vm0, %v1071_v30 }
  0x5c   : > { %553 = vmatmul.mubr.bf16.gmra.mxu0 %v1070_v31  ;;  %617 = vmatmul.mubr.bf16.gmra.mxu1 %v1073_v32 }
  0x5d   : > { %928 = vmatprep.mubr.msk.bf16.mxu0 %vm442_vm0, %v1074_v33  ;;  %936 = vmatprep.mubr.msk.bf16.mxu1 %vm442_vm0, %v1077_v34 }
  0x64   : > { %561 = vmatmul.mubr.bf16.gmra.mxu0 %v1076_v36  ;;  %625 = vmatmul.mubr.bf16.gmra.mxu1 %v1079_v37 }
  0x65   : > { %929 = vmatprep.mubr.msk.bf16.mxu0 %vm442_vm0, %v1080_v38  ;;  %937 = vmatprep.mubr.msk.bf16.mxu1 %vm442_vm0, %v910_v39 }
  0x6c   : > { %569 = vmatmul.mubr.bf16.gmra.mxu0 %v1082_v40  ;;  %633 = vmatmul.mubr.bf16.gmra.mxu1 %v909_v41 }
  0x6d   : > { %930 = vmatprep.mubr.msk.bf16.mxu0 %vm442_vm0, %v1085_v42 }
  0x74   : > { %577 = vmatmul.mubr.bf16.gmra.mxu0 %v1087_v43 }
  0xfc   : > { %v522_v45 = vpop.f32.mrf.mxu0  ;;  %v586_v46 = vpop.f32.mrf.mxu1 }
  0xfd   : > { %v523_v47 = vadd.f32 %v1240_v44, %v522_v45  ;;  %v587_v48 = vadd.f32 %v1240_v44, %v586_v46 }
  0xfe   : > { %v524_v49 = vpop.f32.mrf.mxu0  ;;  %v588_v50 = vpop.f32.mrf.mxu1 }
  0xff   : > { %v640_v51 = vmax.f32 %v523_v47, 0.0  ;;  %v656_v52 = vmax.f32 %v587_v48, 0.0 }
 0x100   : > { %v525_v53 = vpop.f32.mrf.mxu0  ;;  %v589_v54 = vpop.f32.mrf.mxu1 }
 0x101   : > { %v970_v55 = vpack.c.bf16 %v640_v51, %v640_v51  ;;  %v526_v56 = vadd.f32 %v1240_v44, %v525_v53  ;;  %v986_v57 = vpack.c.bf16 %v656_v52, %v656_v52  ;;  %v590_v58 = vadd.f32 %v1240_v44, %v589_v54 }
 0x102   : > { %v527_v59 = vpop.f32.mrf.mxu0  ;;  %v591_v60 = vpop.f32.mrf.mxu1 }
 0x103   : > { %787 = vst.msk [vmem:[%s1248_s23] sm:$0xf] %vm786_vm1, %v970_v55  ;;  %v641_v61 = vmax.f32 %v526_v56, 0.0  ;;  %803 = vst.msk [vmem:[%s1248_s23 + $0x40] sm:$0xf] %vm786_vm1, %v986_v57  ;;  %v657_v62 = vmax.f32 %v590_v58, 0.0 }
 0x104   : > { %v530_v63 = vpop.f32.mrf.mxu0  ;;  %v594_v0 = vpop.f32.mrf.mxu1 }
 0x105   : > { %v971_v1 = vpack.c.bf16 %v641_v61, %v641_v61  ;;  %v531_v2 = vadd.f32 %v1240_v44, %v530_v63  ;;  %v987_v3 = vpack.c.bf16 %v657_v62, %v657_v62  ;;  %v595_v4 = vadd.f32 %v1240_v44, %v594_v0 }
 0x106   : > { %v532_v5 = vpop.f32.mrf.mxu0  ;;  %v596_v6 = vpop.f32.mrf.mxu1 }
 0x107   : > { %788 = vst.msk [vmem:[%s1248_s23 + $0x4] sm:$0xf] %vm786_vm1, %v971_v1  ;;  %v642_v7 = vmax.f32 %v531_v2, 0.0  ;;  %804 = vst.msk [vmem:[%s1248_s23 + $0x44] sm:$0xf] %vm786_vm1, %v987_v3  ;;  %v658_v8 = vmax.f32 %v595_v4, 0.0 }
 0x108   : > { %v533_v9 = vpop.f32.mrf.mxu0  ;;  %v597_v10 = vpop.f32.mrf.mxu1 }
 0x109   : > { %v972_v11 = vpack.c.bf16 %v642_v7, %v642_v7  ;;  %v534_v12 = vadd.f32 %v1240_v44, %v533_v9  ;;  %v988_v13 = vpack.c.bf16 %v658_v8, %v658_v8  ;;  %v598_v14 = vadd.f32 %v1240_v44, %v597_v10 }
 0x10a   : > { %v535_v15 = vpop.f32.mrf.mxu0  ;;  %v599_v16 = vpop.f32.mrf.mxu1 }
 0x10b   : > { %789 = vst.msk [vmem:[%s1248_s23 + $0x8] sm:$0xf] %vm786_vm1, %v972_v11  ;;  %v643_v17 = vmax.f32 %v534_v12, 0.0  ;;  %805 = vst.msk [vmem:[%s1248_s23 + $0x48] sm:$0xf] %vm786_vm1, %v988_v13  ;;  %v659_v18 = vmax.f32 %v598_v14, 0.0 }
 0x10c   : > { %v538_v19 = vpop.f32.mrf.mxu0  ;;  %v602_v20 = vpop.f32.mrf.mxu1 }
 0x10d   : > { %v973_v21 = vpack.c.bf16 %v643_v17, %v643_v17  ;;  %v539_v22 = vadd.f32 %v1240_v44, %v538_v19  ;;  %v989_v23 = vpack.c.bf16 %v659_v18, %v659_v18  ;;  %v603_v24 = vadd.f32 %v1240_v44, %v602_v20 }
 0x10e   : > { %v540_v25 = vpop.f32.mrf.mxu0  ;;  %v604_v26 = vpop.f32.mrf.mxu1 }
 0x10f   : > { %790 = vst.msk [vmem:[%s1248_s23 + $0xc] sm:$0xf] %vm786_vm1, %v973_v21  ;;  %v644_v27 = vmax.f32 %v539_v22, 0.0  ;;  %806 = vst.msk [vmem:[%s1248_s23 + $0x4c] sm:$0xf] %vm786_vm1, %v989_v23  ;;  %v660_v28 = vmax.f32 %v603_v24, 0.0 }
 0x110   : > { %v541_v29 = vpop.f32.mrf.mxu0  ;;  %v605_v30 = vpop.f32.mrf.mxu1 }
 0x111   : > { %v974_v31 = vpack.c.bf16 %v644_v27, %v644_v27  ;;  %v542_v32 = vadd.f32 %v1240_v44, %v541_v29  ;;  %v990_v33 = vpack.c.bf16 %v660_v28, %v660_v28  ;;  %v606_v34 = vadd.f32 %v1240_v44, %v605_v30 }
 0x112   : > { %v543_v35 = vpop.f32.mrf.mxu0  ;;  %v607_v36 = vpop.f32.mrf.mxu1 }
 0x113   : > { %791 = vst.msk [vmem:[%s1248_s23 + $0x10] sm:$0xf] %vm786_vm1, %v974_v31  ;;  %v645_v37 = vmax.f32 %v542_v32, 0.0  ;;  %807 = vst.msk [vmem:[%s1248_s23 + $0x50] sm:$0xf] %vm786_vm1, %v990_v33  ;;  %v661_v38 = vmax.f32 %v606_v34, 0.0 }
 0x114   : > { %v546_v39 = vpop.f32.mrf.mxu0  ;;  %v610_v40 = vpop.f32.mrf.mxu1 }
 0x115   : > { %v975_v41 = vpack.c.bf16 %v645_v37, %v645_v37  ;;  %v547_v42 = vadd.f32 %v1240_v44, %v546_v39  ;;  %v991_v43 = vpack.c.bf16 %v661_v38, %v661_v38  ;;  %v611_v45 = vadd.f32 %v1240_v44, %v610_v40 }
 0x116   : > { %v548_v46 = vpop.f32.mrf.mxu0  ;;  %v612_v47 = vpop.f32.mrf.mxu1 }
 0x117   : > { %792 = vst.msk [vmem:[%s1248_s23 + $0x14] sm:$0xf] %vm786_vm1, %v975_v41  ;;  %v646_v48 = vmax.f32 %v547_v42, 0.0  ;;  %808 = vst.msk [vmem:[%s1248_s23 + $0x54] sm:$0xf] %vm786_vm1, %v991_v43  ;;  %v662_v49 = vmax.f32 %v611_v45, 0.0 }
 0x118   : > { %v549_v50 = vpop.f32.mrf.mxu0  ;;  %v613_v51 = vpop.f32.mrf.mxu1 }
 0x119   : > { %v976_v52 = vpack.c.bf16 %v646_v48, %v646_v48  ;;  %v550_v53 = vadd.f32 %v1240_v44, %v549_v50  ;;  %v992_v54 = vpack.c.bf16 %v662_v49, %v662_v49  ;;  %v614_v55 = vadd.f32 %v1240_v44, %v613_v51 }
 0x11a   : > { %v551_v56 = vpop.f32.mrf.mxu0  ;;  %v615_v57 = vpop.f32.mrf.mxu1 }
 0x11b   : > { %793 = vst.msk [vmem:[%s1248_s23 + $0x18] sm:$0xf] %vm786_vm1, %v976_v52  ;;  %v647_v58 = vmax.f32 %v550_v53, 0.0  ;;  %809 = vst.msk [vmem:[%s1248_s23 + $0x58] sm:$0xf] %vm786_vm1, %v992_v54  ;;  %v663_v59 = vmax.f32 %v614_v55, 0.0 }
 0x11c   : > { %v554_v60 = vpop.f32.mrf.mxu0  ;;  %v618_v61 = vpop.f32.mrf.mxu1 }
 0x11d   : > { %v977_v62 = vpack.c.bf16 %v647_v58, %v647_v58  ;;  %v555_v63 = vadd.f32 %v1240_v44, %v554_v60  ;;  %v993_v0 = vpack.c.bf16 %v663_v59, %v663_v59  ;;  %v619_v1 = vadd.f32 %v1240_v44, %v618_v61 }
 0x11e   : > { %v556_v2 = vpop.f32.mrf.mxu0  ;;  %v620_v3 = vpop.f32.mrf.mxu1 }
 0x11f   : > { %794 = vst.msk [vmem:[%s1248_s23 + $0x1c] sm:$0xf] %vm786_vm1, %v977_v62  ;;  %v648_v4 = vmax.f32 %v555_v63, 0.0  ;;  %810 = vst.msk [vmem:[%s1248_s23 + $0x5c] sm:$0xf] %vm786_vm1, %v993_v0  ;;  %v664_v5 = vmax.f32 %v619_v1, 0.0 }
 0x120   : > { %v557_v6 = vpop.f32.mrf.mxu0  ;;  %v621_v7 = vpop.f32.mrf.mxu1 }
 0x121   : > { %v978_v8 = vpack.c.bf16 %v648_v4, %v648_v4  ;;  %v558_v9 = vadd.f32 %v1240_v44, %v557_v6  ;;  %v994_v10 = vpack.c.bf16 %v664_v5, %v664_v5  ;;  %v622_v11 = vadd.f32 %v1240_v44, %v621_v7 }
 0x122   : > { %v559_v12 = vpop.f32.mrf.mxu0  ;;  %v623_v13 = vpop.f32.mrf.mxu1 }
 0x123   : > { %795 = vst.msk [vmem:[%s1248_s23 + $0x20] sm:$0xf] %vm786_vm1, %v978_v8  ;;  %v649_v14 = vmax.f32 %v558_v9, 0.0  ;;  %811 = vst.msk [vmem:[%s1248_s23 + $0x60] sm:$0xf] %vm786_vm1, %v994_v10  ;;  %v665_v15 = vmax.f32 %v622_v11, 0.0 }
 0x124   : > { %v562_v16 = vpop.f32.mrf.mxu0  ;;  %v626_v17 = vpop.f32.mrf.mxu1 }
 0x125   : > { %v979_v18 = vpack.c.bf16 %v649_v14, %v649_v14  ;;  %v563_v19 = vadd.f32 %v1240_v44, %v562_v16  ;;  %v995_v20 = vpack.c.bf16 %v665_v15, %v665_v15  ;;  %v627_v21 = vadd.f32 %v1240_v44, %v626_v17 }
 0x126   : > { %v564_v22 = vpop.f32.mrf.mxu0  ;;  %v628_v23 = vpop.f32.mrf.mxu1 }
 0x127   : > { %796 = vst.msk [vmem:[%s1248_s23 + $0x24] sm:$0xf] %vm786_vm1, %v979_v18  ;;  %v650_v24 = vmax.f32 %v563_v19, 0.0  ;;  %812 = vst.msk [vmem:[%s1248_s23 + $0x64] sm:$0xf] %vm786_vm1, %v995_v20  ;;  %v666_v25 = vmax.f32 %v627_v21, 0.0 }
 0x128   : > { %v565_v26 = vpop.f32.mrf.mxu0  ;;  %v629_v27 = vpop.f32.mrf.mxu1 }
 0x129   : > { %v980_v28 = vpack.c.bf16 %v650_v24, %v650_v24  ;;  %v566_v29 = vadd.f32 %v1240_v44, %v565_v26  ;;  %v996_v30 = vpack.c.bf16 %v666_v25, %v666_v25  ;;  %v630_v31 = vadd.f32 %v1240_v44, %v629_v27 }
 0x12a   : > { %v567_v32 = vpop.f32.mrf.mxu0  ;;  %v631_v33 = vpop.f32.mrf.mxu1 }
 0x12b   : > { %797 = vst.msk [vmem:[%s1248_s23 + $0x28] sm:$0xf] %vm786_vm1, %v980_v28  ;;  %v651_v34 = vmax.f32 %v566_v29, 0.0  ;;  %813 = vst.msk [vmem:[%s1248_s23 + $0x68] sm:$0xf] %vm786_vm1, %v996_v30  ;;  %v667_v35 = vmax.f32 %v630_v31, 0.0 }
 0x12c   : > { %v570_v36 = vpop.f32.mrf.mxu0  ;;  %v634_v37 = vpop.f32.mrf.mxu1 }
 0x12d   : > { %v981_v38 = vpack.c.bf16 %v651_v34, %v651_v34  ;;  %v571_v39 = vadd.f32 %v1240_v44, %v570_v36  ;;  %v997_v40 = vpack.c.bf16 %v667_v35, %v667_v35  ;;  %v635_v41 = vadd.f32 %v1240_v44, %v634_v37 }
 0x12e   : > { %v572_v42 = vpop.f32.mrf.mxu0  ;;  %v636_v43 = vpop.f32.mrf.mxu1 }
 0x12f   : > { %798 = vst.msk [vmem:[%s1248_s23 + $0x2c] sm:$0xf] %vm786_vm1, %v981_v38  ;;  %v652_v45 = vmax.f32 %v571_v39, 0.0  ;;  %814 = vst.msk [vmem:[%s1248_s23 + $0x6c] sm:$0xf] %vm786_vm1, %v997_v40  ;;  %v668_v46 = vmax.f32 %v635_v41, 0.0 }
 0x130   : > { %v573_v47 = vpop.f32.mrf.mxu0  ;;  %v637_v48 = vpop.f32.mrf.mxu1 }
 0x131   : > { %v982_v49 = vpack.c.bf16 %v652_v45, %v652_v45  ;;  %v574_v50 = vadd.f32 %v1240_v44, %v573_v47  ;;  %v998_v51 = vpack.c.bf16 %v668_v46, %v668_v46 }
 0x132   : > { %v575_v52 = vpop.f32.mrf.mxu0  ;;  %v638_v53 = vpop.f32.mrf.mxu1 }
 0x133   : > { %799 = vst.msk [vmem:[%s1248_s23 + $0x30] sm:$0xf] %vm786_vm1, %v982_v49  ;;  %v653_v54 = vmax.f32 %v574_v50, 0.0  ;;  %815 = vst.msk [vmem:[%s1248_s23 + $0x70] sm:$0xf] %vm786_vm1, %v998_v51 }
 0x134   : > { %v578_v55 = vpop.f32.mrf.mxu0 }
 0x135   : > { %v983_v56 = vpack.c.bf16 %v653_v54, %v653_v54  ;;  %v579_v57 = vadd.f32 %v1240_v44, %v578_v55 }
 0x136   : > { %v580_v58 = vpop.f32.mrf.mxu0 }
 0x137   : > { %800 = vst.msk [vmem:[%s1248_s23 + $0x34] sm:$0xf] %vm786_vm1, %v983_v56  ;;  %v654_v59 = vmax.f32 %v579_v57, 0.0 }
 0x138   : > { %v581_v60 = vpop.f32.mrf.mxu0 }
 0x139   : > { %v984_v61 = vpack.c.bf16 %v654_v59, %v654_v59  ;;  %v582_v62 = vadd.f32 %v1240_v44, %v581_v60 }
 0x13a   : > { %v583_v63 = vpop.f32.mrf.mxu0 }
 0x13b   : > { %801 = vst.msk [vmem:[%s1248_s23 + $0x38] sm:$0xf] %vm786_vm1, %v984_v61  ;;  %v655_v0 = vmax.f32 %v582_v62, 0.0 }
 0x13d   : > { %v985_v1 = vpack.c.bf16 %v655_v0, %v655_v0 }
 0x13f   : > { %802 = vst.msk [vmem:[%s1248_s23 + $0x3c] sm:$0xf] %vm786_vm1, %v985_v1 }
 0x140 PF: > { %s13_s12 = sadd.s32 1, %s1094_s12  }
 0x141   : > { %p10_p4 = scmp.ge.s32.totalorder %s13_s12, 4  }
 0x143   :  { %12 = sbr.rel (!%p10_p4) target bundleno = 1 (0x1), region = 62 }

// kernel: encoder_forward.5
= control target key start
LH: loop header
LB: loop body
LE: loop exit
PB: predicated region body
PF: predicated region fallthrough
CT: control target
= control target key end

     0   :  { %vm580_vm0 = vcmask 519168   ;;  %s1037_s1 = inlined_call_operand.vmem [shape: bf16[512,64], index: 1, kind: input, shape index: {}]   ;;  %s1038_s0 = inlined_call_operand.vmem [shape: bf16[72,512], index: 0, kind: input, shape index: {}]   ;;  %s1039_s2 = inlined_call_operand.vmem [shape: f32[1,64], index: 2, kind: input, shape index: {}]   ;;  %s1040_s3 = inlined_call_operand.vmem [shape: bf16[72,64], index: 3, kind: output, shape index: {}]  }
   0x1   :  { %v757_v0 = vld [vmem:[%s1037_s1 + $0x78] sm:$0xff]   ;;  %v761_v4 = vld [vmem:[%s1037_s1 + $0x70] sm:$0xff]   ;;  %v765_v8 = vld [vmem:[%s1037_s1 + $0x68] sm:$0xff]  }
   0x2   :  { %v758_v1 = vld [vmem:[%s1037_s1 + $0xf8] sm:$0xff]   ;;  %665 = vmatprep.subr.bf16.mxu0 %v757_v0  ;;  %v762_v5 = vld [vmem:[%s1037_s1 + $0xf0] sm:$0xff]   ;;  %v766_v9 = vld [vmem:[%s1037_s1 + $0xe8] sm:$0xff]  }
   0x3   :  { %v759_v2 = vld [vmem:[%s1037_s1 + $0x38] sm:$0xff]   ;;  %711 = vmatprep.subr.bf16.mxu1 %v758_v1  ;;  %v763_v6 = vld [vmem:[%s1037_s1 + $0x30] sm:$0xff]   ;;  %v767_v10 = vld [vmem:[%s1037_s1 + $0x28] sm:$0xff]  }
   0x4   :  { %v760_v3 = vld [vmem:[%s1037_s1 + $0xb8] sm:$0xff]   ;;  %666 = vmatpush3.bf16.msra.mxu0 %v759_v2  ;;  %v764_v7 = vld [vmem:[%s1037_s1 + $0xb0] sm:$0xff]   ;;  %v768_v11 = vld [vmem:[%s1037_s1 + $0xa8] sm:$0xff]  }
   0x5   :  { %712 = vmatpush3.bf16.msra.mxu1 %v760_v3  ;;  %667 = vmatprep.subr.bf16.mxu0 %v761_v4  ;;  %v769_v12 = vld [vmem:[%s1037_s1 + $0x60] sm:$0xff]   ;;  %v773_v16 = vld [vmem:[%s1037_s1 + $0x58] sm:$0xff]   ;;  %v777_v20 = vld [vmem:[%s1037_s1 + $0x50] sm:$0xff]  }
   0x6   :  { %713 = vmatprep.subr.bf16.mxu1 %v762_v5  ;;  %v770_v13 = vld [vmem:[%s1037_s1 + $0xe0] sm:$0xff]   ;;  %v774_v17 = vld [vmem:[%s1037_s1 + $0xd8] sm:$0xff]   ;;  %v778_v21 = vld [vmem:[%s1037_s1 + $0xd0] sm:$0xff]  }
   0x7   :  { %v771_v14 = vld [vmem:[%s1037_s1 + $0x20] sm:$0xff]   ;;  %v775_v18 = vld [vmem:[%s1037_s1 + $0x18] sm:$0xff]   ;;  %v779_v22 = vld [vmem:[%s1037_s1 + $0x10] sm:$0xff]  }
   0x8   :  { %668 = vmatpush3.bf16.msra.mxu0 %v763_v6  ;;  %v772_v15 = vld [vmem:[%s1037_s1 + $0xa0] sm:$0xff]   ;;  %v776_v19 = vld [vmem:[%s1037_s1 + $0x98] sm:$0xff]   ;;  %v780_v23 = vld [vmem:[%s1037_s1 + $0x90] sm:$0xff]  }
   0x9   :  { %714 = vmatpush3.bf16.msra.mxu1 %v764_v7  ;;  %669 = vmatprep.subr.bf16.mxu0 %v765_v8  ;;  %v781_v24 = vld [vmem:[%s1037_s1 + $0x48] sm:$0xff]   ;;  %v785_v28 = vld [vmem:[%s1037_s1 + $0x40] sm:$0xff]  }
   0xa   :  { %715 = vmatprep.subr.bf16.mxu1 %v766_v9  ;;  %v782_v25 = vld [vmem:[%s1037_s1 + $0xc8] sm:$0xff]   ;;  %v786_v29 = vld [vmem:[%s1037_s1 + $0xc0] sm:$0xff]  }
   0xb   :  { %v783_v26 = vld [vmem:[%s1037_s1 + $0x8] sm:$0xff]   ;;  %v787_v30 = vld [vmem:[%s1037_s1] sm:$0xff]  }
   0xc   :  { %670 = vmatpush3.bf16.msra.mxu0 %v767_v10  ;;  %v784_v27 = vld [vmem:[%s1037_s1 + $0x88] sm:$0xff]   ;;  %v788_v31 = vld [vmem:[%s1037_s1 + $0x80] sm:$0xff]  }
   0xd   :  { %716 = vmatpush3.bf16.msra.mxu1 %v768_v11  ;;  %671 = vmatprep.subr.bf16.mxu0 %v769_v12  ;;  %v789_v32 = vld [vmem:[%s1038_s0] ss:$16 sps:$4 sm:$0xff]   ;;  %v791_v33 = vld [vmem:[%s1038_s0 + $0x4] ss:$16 sps:$4 sm:$0xff]   ;;  %v792_v34 = vld [vmem:[%s1038_s0 + $0x8] ss:$16 sps:$4 sm:$0xff]  }
   0xe   :  { %717 = vmatprep.subr.bf16.mxu1 %v770_v13  ;;  %v794_v35 = vld [vmem:[%s1038_s0 + $0xc] ss:$16 sps:$4 sm:$0xff]   ;;  %422 = vmatprep.mubr.bf16.mxu0 %v791_v33  ;;  %v795_v36 = vld [vmem:[%s1038_s0 + $0x24] ss:$16 sps:$4 sm:$0xff]   ;;  %v799_v38 = vld [vmem:[%s1038_s0 + $0x20] ss:$16 sps:$4 sm:$0xff]  }
   0xf   :  { %494 = vmatprep.mubr.bf16.mxu1 %v794_v35  ;;  %v797_v37 = vld [vmem:[%s1038_s0 + $0x2c] ss:$16 sps:$4 sm:$0xff]   ;;  %v800_v39 = vld [vmem:[%s1038_s0 + $0x28] ss:$16 sps:$4 sm:$0xff]   ;;  %v801_v40 = vld [vmem:[%s1038_s0 + $0x44] ss:$16 sps:$4 sm:$0xff]  }
  0x10   :  { %672 = vmatpush3.bf16.msra.mxu0 %v771_v14  ;;  %v803_v41 = vld [vmem:[%s1038_s0 + $0x4c] ss:$16 sps:$4 sm:$0xff]   ;;  %v805_v42 = vld [vmem:[%s1038_s0 + $0x40] ss:$16 sps:$4 sm:$0xff]   ;;  %v806_v43 = vld [vmem:[%s1038_s0 + $0x48] ss:$16 sps:$4 sm:$0xff]  }
  0x11   :  { %718 = vmatpush3.bf16.msra.mxu1 %v772_v15  ;;  %673 = vmatprep.subr.bf16.mxu0 %v773_v16  ;;  %v807_v44 = vld [vmem:[%s1038_s0 + $0x64] ss:$16 sps:$4 sm:$0xff]   ;;  %v809_v45 = vld [vmem:[%s1038_s0 + $0x6c] ss:$16 sps:$4 sm:$0xff]   ;;  %v811_v48 = vld [vmem:[%s1038_s0 + $0x60] ss:$16 sps:$4 sm:$0xff]  }
  0x12   :  { %719 = vmatprep.subr.bf16.mxu1 %v774_v17  ;;  %v31_v46 = vld [vmem:[%s1038_s0 + $0x80] sm:$0xff]  ;;  %v32_v47 = vld [vmem:[%s1038_s0 + $0x88] sm:$0xff] }
  0x13   :  { %v812_v49 = vld [vmem:[%s1038_s0 + $0x68] ss:$16 sps:$4 sm:$0xff]   ;;  %v612_v50 = vcombine.high %v31_v46, %v31_v46  ;;  %v614_v51 = vcombine.high %v32_v47, %v32_v47  ;;  %v611_v52 = vcombine.low %v31_v46, %v31_v46  ;;  %v613_v53 = vcombine.low %v32_v47, %v32_v47  ;;  %v990_v56 = vld [vmem:[%s1039_s2] ss:$0 sm:$0xff] }
  0x14   :  { %674 = vmatpush3.bf16.msra.mxu0 %v775_v18 }
  0x15   :  { %720 = vmatpush3.bf16.msra.mxu1 %v776_v19  ;;  %675 = vmatprep.subr.bf16.mxu0 %v777_v20 }
  0x16   :  { %721 = vmatprep.subr.bf16.mxu1 %v778_v21 }
  0x18   :  { %676 = vmatpush3.bf16.msra.mxu0 %v779_v22 }
  0x19   :  { %722 = vmatpush3.bf16.msra.mxu1 %v780_v23  ;;  %677 = vmatprep.subr.bf16.mxu0 %v781_v24 }
  0x1a   :  { %723 = vmatprep.subr.bf16.mxu1 %v782_v25 }
  0x1c   :  { %678 = vmatpush3.bf16.msra.mxu0 %v783_v26 }
  0x1d   :  { %724 = vmatpush3.bf16.msra.mxu1 %v784_v27  ;;  %679 = vmatprep.subr.bf16.mxu0 %v785_v28 }
  0x1e   :  { %725 = vmatprep.subr.bf16.mxu1 %v786_v29 }
  0x20   :  { %680 = vmatpush3.bf16.msra.mxu0 %v787_v30 }
  0x21   :  { %726 = vmatpush3.bf16.msra.mxu1 %v788_v31 }
  0x23   :  { %423 = vmatmul.mubr.bf16.vlgmr.msra.gmra.mxu0 %v789_v32 }
  0x24   :  { %495 = vmatmul.mubr.bf16.vlgmr.msra.gmra.mxu1 %v792_v34  ;;  %430 = vmatprep.mubr.bf16.mxu0 %v795_v36 }
  0x25   :  { %502 = vmatprep.mubr.bf16.mxu1 %v797_v37 }
  0x2b   :  { %431 = vmatmul.mubr.bf16.gmra.mxu0 %v799_v38 }
  0x2c   :  { %503 = vmatmul.mubr.bf16.gmra.mxu1 %v800_v39  ;;  %438 = vmatprep.mubr.bf16.mxu0 %v801_v40 }
  0x2d   :  { %510 = vmatprep.mubr.bf16.mxu1 %v803_v41 }
  0x33   :  { %439 = vmatmul.mubr.bf16.gmra.mxu0 %v805_v42 }
  0x34   :  { %511 = vmatmul.mubr.bf16.gmra.mxu1 %v806_v43  ;;  %446 = vmatprep.mubr.bf16.mxu0 %v807_v44 }
  0x35   :  { %518 = vmatprep.mubr.bf16.mxu1 %v809_v45 }
  0x3b   :  { %447 = vmatmul.mubr.bf16.gmra.mxu0 %v811_v48 }
  0x3c   :  { %519 = vmatmul.mubr.bf16.gmra.mxu1 %v812_v49  ;;  %454 = vmatprep.mubr.bf16.mxu0 %v612_v50 }
  0x3d   :  { %526 = vmatprep.mubr.bf16.mxu1 %v614_v51 }
  0x43   :  { %455 = vmatmul.mubr.bf16.gmra.mxu0 %v611_v52 }
  0x44   :  { %527 = vmatmul.mubr.bf16.gmra.mxu1 %v613_v53 }
  0xe3   :  { %v681_v54 = vpop.f32.mrf.mxu0 }
  0xe4   :  { %v727_v55 = vpop.f32.mrf.mxu1 }
  0xe5   :  { %v682_v57 = vpop.f32.mrf.mxu0 }
  0xe6   :  { %v683_v58 = vadd.f32 %v682_v57, %v681_v54  ;;  %v728_v59 = vpop.f32.mrf.mxu1 }
  0xe7   :  { %v684_v60 = vpop.f32.mrf.mxu0  ;;  %v729_v62 = vadd.f32 %v728_v59, %v727_v55 }
  0xe8   :  { %v425_v61 = vadd.f32 %v683_v58, %v990_v56  ;;  %v730_v63 = vpop.f32.mrf.mxu1 }
  0xe9   :  { %v685_v0 = vpop.f32.mrf.mxu0 }
  0xea   :  { %v497_v1 = vadd.f32 %v729_v62, %v425_v61  ;;  %v686_v2 = vadd.f32 %v685_v0, %v684_v60  ;;  %v731_v3 = vpop.f32.mrf.mxu1 }
  0xeb   :  { %v687_v4 = vpop.f32.mrf.mxu0  ;;  %v732_v7 = vadd.f32 %v731_v3, %v730_v63 }
  0xec   :  { %v534_v5 = vmax.f32 %v497_v1, 0.0  ;;  %v428_v6 = vadd.f32 %v686_v2, %v990_v56  ;;  %v733_v8 = vpop.f32.mrf.mxu1 }
  0xed   :  { %v688_v9 = vpop.f32.mrf.mxu0 }
  0xee   :  { %v656_v10 = vpack.c.bf16 %v534_v5, %v534_v5  ;;  %v500_v11 = vadd.f32 %v732_v7, %v428_v6  ;;  %v689_v12 = vadd.f32 %v688_v9, %v687_v4  ;;  %v734_v13 = vpop.f32.mrf.mxu1 }
  0xef   :  { %v690_v14 = vpop.f32.mrf.mxu0  ;;  %v735_v17 = vadd.f32 %v734_v13, %v733_v8 }
  0xf0   :  { %581 = vst.msk [vmem:[%s1040_s3] sm:$0xf] %vm580_vm0, %v656_v10  ;;  %v535_v15 = vmax.f32 %v500_v11, 0.0  ;;  %v433_v16 = vadd.f32 %v689_v12, %v990_v56  ;;  %v736_v18 = vpop.f32.mrf.mxu1 }
  0xf1   :  { %v691_v19 = vpop.f32.mrf.mxu0 }
  0xf2   :  { %v657_v20 = vpack.c.bf16 %v535_v15, %v535_v15  ;;  %v505_v21 = vadd.f32 %v735_v17, %v433_v16  ;;  %v692_v22 = vadd.f32 %v691_v19, %v690_v14  ;;  %v737_v23 = vpop.f32.mrf.mxu1 }
  0xf3   :  { %v693_v24 = vpop.f32.mrf.mxu0  ;;  %v738_v27 = vadd.f32 %v737_v23, %v736_v18 }
  0xf4   :  { %582 = vst.msk [vmem:[%s1040_s3 + $0x4] sm:$0xf] %vm580_vm0, %v657_v20  ;;  %v536_v25 = vmax.f32 %v505_v21, 0.0  ;;  %v436_v26 = vadd.f32 %v692_v22, %v990_v56  ;;  %v739_v28 = vpop.f32.mrf.mxu1 }
  0xf5   :  { %v694_v29 = vpop.f32.mrf.mxu0 }
  0xf6   :  { %v658_v30 = vpack.c.bf16 %v536_v25, %v536_v25  ;;  %v508_v31 = vadd.f32 %v738_v27, %v436_v26  ;;  %v695_v32 = vadd.f32 %v694_v29, %v693_v24  ;;  %v740_v33 = vpop.f32.mrf.mxu1 }
  0xf7   :  { %v696_v34 = vpop.f32.mrf.mxu0  ;;  %v741_v37 = vadd.f32 %v740_v33, %v739_v28 }
  0xf8   :  { %583 = vst.msk [vmem:[%s1040_s3 + $0x8] sm:$0xf] %vm580_vm0, %v658_v30  ;;  %v537_v35 = vmax.f32 %v508_v31, 0.0  ;;  %v441_v36 = vadd.f32 %v695_v32, %v990_v56  ;;  %v742_v38 = vpop.f32.mrf.mxu1 }
  0xf9   :  { %v697_v39 = vpop.f32.mrf.mxu0 }
  0xfa   :  { %v659_v40 = vpack.c.bf16 %v537_v35, %v537_v35  ;;  %v513_v41 = vadd.f32 %v741_v37, %v441_v36  ;;  %v698_v42 = vadd.f32 %v697_v39, %v696_v34  ;;  %v743_v43 = vpop.f32.mrf.mxu1 }
  0xfb   :  { %v699_v44 = vpop.f32.mrf.mxu0  ;;  %v744_v47 = vadd.f32 %v743_v43, %v742_v38 }
  0xfc   :  { %584 = vst.msk [vmem:[%s1040_s3 + $0xc] sm:$0xf] %vm580_vm0, %v659_v40  ;;  %v538_v45 = vmax.f32 %v513_v41, 0.0  ;;  %v444_v46 = vadd.f32 %v698_v42, %v990_v56  ;;  %v745_v48 = vpop.f32.mrf.mxu1 }
  0xfd   :  { %v700_v49 = vpop.f32.mrf.mxu0 }
  0xfe   :  { %v660_v50 = vpack.c.bf16 %v538_v45, %v538_v45  ;;  %v516_v51 = vadd.f32 %v744_v47, %v444_v46  ;;  %v701_v52 = vadd.f32 %v700_v49, %v699_v44  ;;  %v746_v53 = vpop.f32.mrf.mxu1 }
  0xff   :  { %v702_v54 = vpop.f32.mrf.mxu0  ;;  %v747_v58 = vadd.f32 %v746_v53, %v745_v48 }
 0x100   :  { %585 = vst.msk [vmem:[%s1040_s3 + $0x10] sm:$0xf] %vm580_vm0, %v660_v50  ;;  %v539_v55 = vmax.f32 %v516_v51, 0.0  ;;  %v449_v57 = vadd.f32 %v701_v52, %v990_v56  ;;  %v748_v59 = vpop.f32.mrf.mxu1 }
 0x101   :  { %v703_v60 = vpop.f32.mrf.mxu0 }
 0x102   :  { %v661_v61 = vpack.c.bf16 %v539_v55, %v539_v55  ;;  %v521_v62 = vadd.f32 %v747_v58, %v449_v57  ;;  %v704_v63 = vadd.f32 %v703_v60, %v702_v54  ;;  %v749_v0 = vpop.f32.mrf.mxu1 }
 0x103   :  { %v705_v1 = vpop.f32.mrf.mxu0  ;;  %v750_v4 = vadd.f32 %v749_v0, %v748_v59 }
 0x104   :  { %586 = vst.msk [vmem:[%s1040_s3 + $0x14] sm:$0xf] %vm580_vm0, %v661_v61  ;;  %v540_v2 = vmax.f32 %v521_v62, 0.0  ;;  %v452_v3 = vadd.f32 %v704_v63, %v990_v56  ;;  %v751_v5 = vpop.f32.mrf.mxu1 }
 0x105   :  { %v706_v6 = vpop.f32.mrf.mxu0 }
 0x106   :  { %v662_v7 = vpack.c.bf16 %v540_v2, %v540_v2  ;;  %v524_v8 = vadd.f32 %v750_v4, %v452_v3  ;;  %v707_v9 = vadd.f32 %v706_v6, %v705_v1  ;;  %v752_v10 = vpop.f32.mrf.mxu1 }
 0x107   :  { %v708_v11 = vpop.f32.mrf.mxu0  ;;  %v753_v14 = vadd.f32 %v752_v10, %v751_v5 }
 0x108   :  { %587 = vst.msk [vmem:[%s1040_s3 + $0x18] sm:$0xf] %vm580_vm0, %v662_v7  ;;  %v541_v12 = vmax.f32 %v524_v8, 0.0  ;;  %v457_v13 = vadd.f32 %v707_v9, %v990_v56  ;;  %v754_v15 = vpop.f32.mrf.mxu1 }
 0x109   :  { %v709_v16 = vpop.f32.mrf.mxu0 }
 0x10a   :  { %v663_v17 = vpack.c.bf16 %v541_v12, %v541_v12  ;;  %v529_v18 = vadd.f32 %v753_v14, %v457_v13  ;;  %v755_v19 = vpop.f32.mrf.mxu1 }
 0x10c   :  { %588 = vst.msk [vmem:[%s1040_s3 + $0x1c] sm:$0xf] %vm580_vm0, %v663_v17  ;;  %v542_v20 = vmax.f32 %v529_v18, 0.0 }
 0x10e   :  { %v664_v21 = vpack.c.bf16 %v542_v20, %v542_v20 }
 0x110   :  { %589 = vst.msk [vmem:[%s1040_s3 + $0x20] sm:$0xf] %vm580_vm0, %v664_v21 }

// kernel: encoder_forward.6
= control target key start
LH: loop header
LB: loop body
LE: loop exit
PB: predicated region body
PF: predicated region fallthrough
CT: control target
= control target key end

     0   :  { %vm372_vm0 = vcmask 523264   ;;  %vm546_vm1 = vcmask 519168   ;;  %s913_s1 = inlined_call_operand.vmem [shape: bf16[576,64], index: 1, kind: input, shape index: {}]   ;;  %s914_s0 = inlined_call_operand.vmem [shape: bf16[32,576], index: 0, kind: input, shape index: {}]   ;;  %s915_s2 = inlined_call_operand.vmem [shape: f32[1,64], index: 2, kind: input, shape index: {}]   ;;  %s916_s3 = inlined_call_operand.vmem [shape: bf16[32,64], index: 3, kind: output, shape index: {}]  }
   0x1   :  { %v686_v0 = vld [vmem:[%s913_s1 + $0x78] sm:$0xff]   ;;  %v690_v4 = vld [vmem:[%s913_s1 + $0x70] sm:$0xff]   ;;  %v694_v8 = vld [vmem:[%s913_s1 + $0x68] sm:$0xff]  }
   0x2   :  { %v687_v1 = vld [vmem:[%s913_s1 + $0xf8] sm:$0xff]   ;;  %612 = vmatprep.subr.bf16.mxu0 %v686_v0  ;;  %v691_v5 = vld [vmem:[%s913_s1 + $0xf0] sm:$0xff]   ;;  %v695_v9 = vld [vmem:[%s913_s1 + $0xe8] sm:$0xff]  }
   0x3   :  { %v688_v2 = vld [vmem:[%s913_s1 + $0x38] sm:$0xff]   ;;  %640 = vmatprep.subr.bf16.mxu1 %v687_v1  ;;  %v692_v6 = vld [vmem:[%s913_s1 + $0x30] sm:$0xff]   ;;  %v696_v10 = vld [vmem:[%s913_s1 + $0x28] sm:$0xff]  }
   0x4   :  { %v689_v3 = vld [vmem:[%s913_s1 + $0xb8] sm:$0xff]   ;;  %613 = vmatpush3.bf16.msra.mxu0 %v688_v2  ;;  %v693_v7 = vld [vmem:[%s913_s1 + $0xb0] sm:$0xff]   ;;  %v697_v11 = vld [vmem:[%s913_s1 + $0xa8] sm:$0xff]  }
   0x5   :  { %641 = vmatpush3.bf16.msra.mxu1 %v689_v3  ;;  %614 = vmatprep.subr.bf16.mxu0 %v690_v4  ;;  %v698_v12 = vld [vmem:[%s913_s1 + $0x60] sm:$0xff]   ;;  %v702_v16 = vld [vmem:[%s913_s1 + $0x58] sm:$0xff]   ;;  %v706_v20 = vld [vmem:[%s913_s1 + $0x50] sm:$0xff]  }
   0x6   :  { %642 = vmatprep.subr.bf16.mxu1 %v691_v5  ;;  %v699_v13 = vld [vmem:[%s913_s1 + $0xe0] sm:$0xff]   ;;  %v703_v17 = vld [vmem:[%s913_s1 + $0xd8] sm:$0xff]   ;;  %v707_v21 = vld [vmem:[%s913_s1 + $0xd0] sm:$0xff]  }
   0x7   :  { %v700_v14 = vld [vmem:[%s913_s1 + $0x20] sm:$0xff]   ;;  %v704_v18 = vld [vmem:[%s913_s1 + $0x18] sm:$0xff]   ;;  %v708_v22 = vld [vmem:[%s913_s1 + $0x10] sm:$0xff]  }
   0x8   :  { %615 = vmatpush3.bf16.msra.mxu0 %v692_v6  ;;  %v701_v15 = vld [vmem:[%s913_s1 + $0xa0] sm:$0xff]   ;;  %v705_v19 = vld [vmem:[%s913_s1 + $0x98] sm:$0xff]   ;;  %v709_v23 = vld [vmem:[%s913_s1 + $0x90] sm:$0xff]  }
   0x9   :  { %643 = vmatpush3.bf16.msra.mxu1 %v693_v7  ;;  %616 = vmatprep.subr.bf16.mxu0 %v694_v8  ;;  %v710_v24 = vld [vmem:[%s913_s1 + $0x48] sm:$0xff]   ;;  %v714_v28 = vld [vmem:[%s913_s1 + $0x40] sm:$0xff]   ;;  %v724_v36 = vld [vmem:[%s913_s1 + $0x118] sm:$0xff]  }
   0xa   :  { %644 = vmatprep.subr.bf16.mxu1 %v695_v9  ;;  %v711_v25 = vld [vmem:[%s913_s1 + $0xc8] sm:$0xff]   ;;  %v715_v29 = vld [vmem:[%s913_s1 + $0xc0] sm:$0xff]   ;;  %v725_v37 = vld [vmem:[%s913_s1 + $0x110] sm:$0xff]  }
   0xb   :  { %v712_v26 = vld [vmem:[%s913_s1 + $0x8] sm:$0xff]   ;;  %v716_v30 = vld [vmem:[%s913_s1] sm:$0xff]  }
   0xc   :  { %617 = vmatpush3.bf16.msra.mxu0 %v696_v10  ;;  %v713_v27 = vld [vmem:[%s913_s1 + $0x88] sm:$0xff]   ;;  %v717_v31 = vld [vmem:[%s913_s1 + $0x80] sm:$0xff]  }
   0xd   :  { %645 = vmatpush3.bf16.msra.mxu1 %v697_v11  ;;  %618 = vmatprep.subr.bf16.mxu0 %v698_v12  ;;  %v718_v32 = vld [vmem:[%s914_s0] ss:$20 sps:$4 sm:$0xff]   ;;  %v720_v33 = vld [vmem:[%s914_s0 + $0x4] ss:$20 sps:$4 sm:$0xff]   ;;  %v721_v34 = vld [vmem:[%s914_s0 + $0x8] ss:$20 sps:$4 sm:$0xff]  }
   0xe   :  { %646 = vmatprep.subr.bf16.mxu1 %v699_v13  ;;  %v723_v35 = vld [vmem:[%s914_s0 + $0xc] ss:$20 sps:$4 sm:$0xff]   ;;  %411 = vmatprep.mubr.bf16.mxu0 %v720_v33  ;;  %v728_v39 = vld [vmem:[%s914_s0 + $0x34] ss:$20 sps:$4 sm:$0xff]   ;;  %v731_v42 = vld [vmem:[%s914_s0 + $0x30] ss:$20 sps:$4 sm:$0xff]  }
   0xf   :  { %460 = vmatprep.mubr.bf16.mxu1 %v723_v35  ;;  %v726_v38 = vld [vmem:[%s914_s0 + $0x2c] ss:$20 sps:$4 sm:$0xff]   ;;  %v730_v40 = vld [vmem:[%s914_s0 + $0x28] ss:$20 sps:$4 sm:$0xff]   ;;  %v734_v43 = vld [vmem:[%s914_s0 + $0x10] ss:$20 sps:$4 sm:$0xff]  }
  0x10   :  { %619 = vmatpush3.bf16.msra.mxu0 %v700_v14  ;;  %v732_v41 = vld [vmem:[%s913_s1 + $0x108] sm:$0xff]   ;;  %v733_v44 = vld [vmem:[%s913_s1 + $0x100] sm:$0xff]  }
  0x11   :  { %647 = vmatpush3.bf16.msra.mxu1 %v701_v15  ;;  %620 = vmatprep.subr.bf16.mxu0 %v702_v16  ;;  %v735_v45 = vld [vmem:[%s914_s0 + $0x38] ss:$20 sps:$4 sm:$0xff]   ;;  %v555_v58 = vld [vmem:[%s915_s2] ss:$0 sm:$0xff] }
  0x12   :  { %648 = vmatprep.subr.bf16.mxu1 %v703_v17 }
  0x14   :  { %621 = vmatpush3.bf16.msra.mxu0 %v704_v18 }
  0x15   :  { %649 = vmatpush3.bf16.msra.mxu1 %v705_v19  ;;  %622 = vmatprep.subr.bf16.mxu0 %v706_v20 }
  0x16   :  { %650 = vmatprep.subr.bf16.mxu1 %v707_v21 }
  0x18   :  { %623 = vmatpush3.bf16.msra.mxu0 %v708_v22 }
  0x19   :  { %651 = vmatpush3.bf16.msra.mxu1 %v709_v23  ;;  %624 = vmatprep.subr.bf16.mxu0 %v710_v24 }
  0x1a   :  { %652 = vmatprep.subr.bf16.mxu1 %v711_v25 }
  0x1c   :  { %625 = vmatpush3.bf16.msra.mxu0 %v712_v26 }
  0x1d   :  { %653 = vmatpush3.bf16.msra.mxu1 %v713_v27  ;;  %626 = vmatprep.subr.bf16.mxu0 %v714_v28 }
  0x1e   :  { %654 = vmatprep.subr.bf16.mxu1 %v715_v29 }
  0x20   :  { %627 = vmatpush3.bf16.msra.mxu0 %v716_v30 }
  0x21   :  { %655 = vmatpush3.bf16.msra.mxu1 %v717_v31  ;;  %674 = vmatprep.subr.bf16.mxu0 %v724_v36 }
  0x23   :  { %412 = vmatmul.mubr.bf16.vlgmr.msra.gmra.mxu0 %v718_v32 }
  0x24   :  { %461 = vmatmul.mubr.bf16.vlgmr.msra.gmra.mxu1 %v721_v34  ;;  %675 = vmatpush3.bf16.msra.mxu0 %v724_v36 }
  0x25   :  { %676 = vmatprep.subr.bf16.mxu0 %v725_v37  ;;  %419 = vmatprep.mubr.bf16.mxu0 %v726_v38 }
  0x26   :  { %468 = vmatprep.mubr.bf16.mxu1 %v728_v39 }
  0x28   :  { %677 = vmatpush3.bf16.msra.mxu0 %v725_v37 }
  0x29   :  { %678 = vmatprep.subr.bf16.mxu0 %v732_v41 }
  0x2b   :  { %420 = vmatmul.mubr.bf16.gmra.mxu0 %v730_v40 }
  0x2c   :  { %469 = vmatmul.mubr.bf16.gmra.mxu1 %v731_v42  ;;  %682 = vmatprep.mubr.msk.bf16.mxu0 %vm372_vm0, %v734_v43 }
  0x2d   :  { %679 = vmatpush3.bf16.msra.mxu0 %v732_v41 }
  0x2e   :  { %680 = vmatprep.subr.bf16.mxu0 %v733_v44 }
  0x31   :  { %681 = vmatpush3.bf16.msra.mxu0 %v733_v44 }
  0x34   :  { %683 = vmatmul.mubr.msk.bf16.vlgmr.msra.gmra.mxu0 %vm372_vm0, %v735_v45 }
  0xe3   :  { %v628_v46 = vpop.f32.mrf.mxu0 }
  0xe4   :  { %v656_v47 = vpop.f32.mrf.mxu1 }
  0xe5   :  { %v629_v48 = vpop.f32.mrf.mxu0 }
  0xe6   :  { %v657_v49 = vpop.f32.mrf.mxu1  ;;  %v630_v56 = vadd.f32 %v629_v48, %v628_v46 }
  0xe7   :  { %v631_v50 = vpop.f32.mrf.mxu0  ;;  %v658_v2 = vadd.f32 %v657_v49, %v656_v47 }
  0xe8   :  { %v659_v51 = vpop.f32.mrf.mxu1  ;;  %v414_v1 = vadd.f32 %v630_v56, %v555_v58 }
  0xe9   :  { %v632_v52 = vpop.f32.mrf.mxu0 }
  0xea   :  { %v660_v53 = vpop.f32.mrf.mxu1  ;;  %v633_v3 = vadd.f32 %v632_v52, %v631_v50  ;;  %v463_v13 = vadd.f32 %v658_v2, %v414_v1 }
  0xeb   :  { %v634_v54 = vpop.f32.mrf.mxu0  ;;  %v661_v16 = vadd.f32 %v660_v53, %v659_v51 }
  0xec   :  { %v662_v55 = vpop.f32.mrf.mxu1  ;;  %v417_v11 = vadd.f32 %v633_v3, %v555_v58 }
  0xed   :  { %v635_v57 = vpop.f32.mrf.mxu0 }
  0xee   :  { %v636_v59 = vadd.f32 %v635_v57, %v634_v54  ;;  %v663_v60 = vpop.f32.mrf.mxu1  ;;  %v466_v23 = vadd.f32 %v661_v16, %v417_v11 }
  0xef   :  { %v664_v61 = vadd.f32 %v663_v60, %v662_v55  ;;  %v637_v62 = vpop.f32.mrf.mxu0 }
  0xf0   :  { %v422_v63 = vadd.f32 %v636_v59, %v555_v58  ;;  %v665_v0 = vpop.f32.mrf.mxu1 }
  0xf1   :  { %v638_v4 = vpop.f32.mrf.mxu0 }
  0xf2   :  { %v639_v5 = vadd.f32 %v638_v4, %v637_v62  ;;  %v666_v6 = vpop.f32.mrf.mxu1  ;;  %v471_v7 = vadd.f32 %v664_v61, %v422_v63 }
  0xf3   :  { %v667_v9 = vadd.f32 %v666_v6, %v665_v0 }
  0xf4   :  { %v425_v8 = vadd.f32 %v639_v5, %v555_v58  ;;  %v684_v10 = vpop.f32.mrf.mxu0 }
  0xf5   :  { %v520_v12 = vadd.f32 %v684_v10, %v471_v7 }
  0xf6   :  { %v511_v14 = vpop.f32.mrf.mxu0  ;;  %v474_v15 = vadd.f32 %v667_v9, %v425_v8 }
  0xf7   :  { %v528_v17 = vmax.f32 %v520_v12, 0.0  ;;  %v512_v18 = vadd.f32 %v511_v14, %v463_v13 }
  0xf8   :  { %v685_v19 = vpop.f32.mrf.mxu0 }
  0xf9   :  { %v610_v20 = vpack.c.bf16 %v528_v17, %v528_v17  ;;  %v526_v21 = vmax.f32 %v512_v18, 0.0  ;;  %v523_v22 = vadd.f32 %v685_v19, %v474_v15 }
  0xfa   :  { %v514_v24 = vpop.f32.mrf.mxu0 }
  0xfb   :  { %549 = vst.msk [vmem:[%s916_s3 + $0x8] sm:$0xf] %vm546_vm1, %v610_v20  ;;  %v608_v25 = vpack.c.bf16 %v526_v21, %v526_v21  ;;  %v529_v26 = vmax.f32 %v523_v22, 0.0  ;;  %v515_v27 = vadd.f32 %v514_v24, %v466_v23 }
  0xfd   :  { %547 = vst.msk [vmem:[%s916_s3] sm:$0xf] %vm546_vm1, %v608_v25  ;;  %v611_v28 = vpack.c.bf16 %v529_v26, %v529_v26  ;;  %v527_v29 = vmax.f32 %v515_v27, 0.0 }
  0xff   :  { %550 = vst.msk [vmem:[%s916_s3 + $0xc] sm:$0xf] %vm546_vm1, %v611_v28  ;;  %v609_v30 = vpack.c.bf16 %v527_v29, %v527_v29 }
 0x101   :  { %548 = vst.msk [vmem:[%s916_s3 + $0x4] sm:$0xf] %vm546_vm1, %v609_v30 }

// kernel: encoder_forward.7
= control target key start
LH: loop header
LB: loop body
LE: loop exit
PB: predicated region body
PF: predicated region fallthrough
CT: control target
= control target key end

     0   :  { %s1771_s1 = inlined_call_operand.vmem [shape: bf16[1024,256], index: 1, kind: input, shape index: {}]   ;;  %s1772_s0 = inlined_call_operand.vmem [shape: bf16[8,1024], index: 0, kind: input, shape index: {}]   ;;  %s1773_s2 = inlined_call_operand.vmem [shape: f32[1,256], index: 2, kind: input, shape index: {}]   ;;  %s1774_s3 = inlined_call_operand.vmem [shape: f32[8,256], index: 3, kind: output, shape index: {}]  }
   0x1   :  { %v1134_v0 = vld [vmem:[%s1771_s1 + $0x74] ss:$8 sps:$4 sm:$0xff]   ;;  %v1138_v2 = vld [vmem:[%s1771_s1 + $0x70] ss:$8 sps:$4 sm:$0xff]   ;;  %v1140_v4 = vld [vmem:[%s1771_s1 + $0x64] ss:$8 sps:$4 sm:$0xff]  }
   0x2   :  { %v1136_v1 = vld [vmem:[%s1771_s1 + $0x174] ss:$8 sps:$4 sm:$0xff]   ;;  %826 = vmatprep.subr.bf16.mxu0 %v1134_v0  ;;  %v1139_v3 = vld [vmem:[%s1771_s1 + $0x170] ss:$8 sps:$4 sm:$0xff]   ;;  %v1142_v5 = vld [vmem:[%s1771_s1 + $0x164] ss:$8 sps:$4 sm:$0xff]  }
   0x3   :  { %867 = vmatprep.subr.bf16.mxu1 %v1136_v1  ;;  %827 = vmatpush1.bf16.msra.mxu0 %v1138_v2  ;;  %v1144_v6 = vld [vmem:[%s1771_s1 + $0x60] ss:$8 sps:$4 sm:$0xff]   ;;  %v1146_v8 = vld [vmem:[%s1771_s1 + $0x54] ss:$8 sps:$4 sm:$0xff]   ;;  %v1150_v10 = vld [vmem:[%s1771_s1 + $0x50] ss:$8 sps:$4 sm:$0xff]  }
   0x4   :  { %868 = vmatpush1.bf16.msra.mxu1 %v1139_v3  ;;  %828 = vmatprep.subr.bf16.mxu0 %v1140_v4  ;;  %v1145_v7 = vld [vmem:[%s1771_s1 + $0x160] ss:$8 sps:$4 sm:$0xff]   ;;  %v1148_v9 = vld [vmem:[%s1771_s1 + $0x154] ss:$8 sps:$4 sm:$0xff]   ;;  %v1151_v11 = vld [vmem:[%s1771_s1 + $0x150] ss:$8 sps:$4 sm:$0xff]  }
   0x5   :  { %869 = vmatprep.subr.bf16.mxu1 %v1142_v5  ;;  %v1152_v12 = vld [vmem:[%s1771_s1 + $0x44] ss:$8 sps:$4 sm:$0xff]   ;;  %v1156_v14 = vld [vmem:[%s1771_s1 + $0x40] ss:$8 sps:$4 sm:$0xff]   ;;  %v1158_v16 = vld [vmem:[%s1771_s1 + $0x34] ss:$8 sps:$4 sm:$0xff]  }
   0x6   :  { %v1154_v13 = vld [vmem:[%s1771_s1 + $0x144] ss:$8 sps:$4 sm:$0xff]   ;;  %v1157_v15 = vld [vmem:[%s1771_s1 + $0x140] ss:$8 sps:$4 sm:$0xff]   ;;  %v1160_v17 = vld [vmem:[%s1771_s1 + $0x134] ss:$8 sps:$4 sm:$0xff]  }
   0x7   :  { %829 = vmatpush1.bf16.msra.mxu0 %v1144_v6  ;;  %v1162_v18 = vld [vmem:[%s1771_s1 + $0x30] ss:$8 sps:$4 sm:$0xff]   ;;  %v1164_v20 = vld [vmem:[%s1771_s1 + $0x24] ss:$8 sps:$4 sm:$0xff]   ;;  %v1168_v22 = vld [vmem:[%s1771_s1 + $0x20] ss:$8 sps:$4 sm:$0xff]  }
   0x8   :  { %870 = vmatpush1.bf16.msra.mxu1 %v1145_v7  ;;  %830 = vmatprep.subr.bf16.mxu0 %v1146_v8  ;;  %v1163_v19 = vld [vmem:[%s1771_s1 + $0x130] ss:$8 sps:$4 sm:$0xff]   ;;  %v1166_v21 = vld [vmem:[%s1771_s1 + $0x124] ss:$8 sps:$4 sm:$0xff]   ;;  %v1169_v23 = vld [vmem:[%s1771_s1 + $0x120] ss:$8 sps:$4 sm:$0xff]  }
   0x9   :  { %871 = vmatprep.subr.bf16.mxu1 %v1148_v9  ;;  %v1170_v24 = vld [vmem:[%s1771_s1 + $0x14] ss:$8 sps:$4 sm:$0xff]   ;;  %v1174_v26 = vld [vmem:[%s1771_s1 + $0x10] ss:$8 sps:$4 sm:$0xff]   ;;  %v1176_v28 = vld [vmem:[%s1771_s1 + $0x4] ss:$8 sps:$4 sm:$0xff]  }
   0xa   :  { %v1172_v25 = vld [vmem:[%s1771_s1 + $0x114] ss:$8 sps:$4 sm:$0xff]   ;;  %v1175_v27 = vld [vmem:[%s1771_s1 + $0x110] ss:$8 sps:$4 sm:$0xff]   ;;  %v1178_v29 = vld [vmem:[%s1771_s1 + $0x104] ss:$8 sps:$4 sm:$0xff]  }
   0xb   :  { %831 = vmatpush1.bf16.msra.mxu0 %v1150_v10  ;;  %v1180_v30 = vld [vmem:[%s1771_s1] ss:$8 sps:$4 sm:$0xff]   ;;  %v1182_v32 = vld [vmem:[%s1771_s1 + $0xf4] ss:$8 sps:$4 sm:$0xff]   ;;  %v1186_v34 = vld [vmem:[%s1771_s1 + $0xf0] ss:$8 sps:$4 sm:$0xff]  }
   0xc   :  { %872 = vmatpush1.bf16.msra.mxu1 %v1151_v11  ;;  %832 = vmatprep.subr.bf16.mxu0 %v1152_v12  ;;  %v1181_v31 = vld [vmem:[%s1771_s1 + $0x100] ss:$8 sps:$4 sm:$0xff]   ;;  %v1184_v33 = vld [vmem:[%s1771_s1 + $0x1f4] ss:$8 sps:$4 sm:$0xff]   ;;  %v1187_v35 = vld [vmem:[%s1771_s1 + $0x1f0] ss:$8 sps:$4 sm:$0xff]  }
   0xd   :  { %873 = vmatprep.subr.bf16.mxu1 %v1154_v13  ;;  %v1188_v36 = vld [vmem:[%s1771_s1 + $0xe4] ss:$8 sps:$4 sm:$0xff]   ;;  %v1192_v38 = vld [vmem:[%s1771_s1 + $0xe0] ss:$8 sps:$4 sm:$0xff]   ;;  %v1194_v40 = vld [vmem:[%s1771_s1 + $0xd4] ss:$8 sps:$4 sm:$0xff]  }
   0xe   :  { %v1190_v37 = vld [vmem:[%s1771_s1 + $0x1e4] ss:$8 sps:$4 sm:$0xff]   ;;  %v1193_v39 = vld [vmem:[%s1771_s1 + $0x1e0] ss:$8 sps:$4 sm:$0xff]   ;;  %v1196_v41 = vld [vmem:[%s1771_s1 + $0x1d4] ss:$8 sps:$4 sm:$0xff]  }
   0xf   :  { %833 = vmatpush1.bf16.msra.mxu0 %v1156_v14  ;;  %v1198_v42 = vld [vmem:[%s1771_s1 + $0xd0] ss:$8 sps:$4 sm:$0xff]   ;;  %v1200_v44 = vld [vmem:[%s1771_s1 + $0xc4] ss:$8 sps:$4 sm:$0xff]   ;;  %v1204_v49 = vld [vmem:[%s1771_s1 + $0xc0] ss:$8 sps:$4 sm:$0xff]  }
  0x10   :  { %874 = vmatpush1.bf16.msra.mxu1 %v1157_v15  ;;  %834 = vmatprep.subr.bf16.mxu0 %v1158_v16  ;;  %v1199_v43 = vld [vmem:[%s1771_s1 + $0x1d0] ss:$8 sps:$4 sm:$0xff]   ;;  %v1202_v45 = vld [vmem:[%s1771_s1 + $0x1c4] ss:$8 sps:$4 sm:$0xff]   ;;  %v1205_v50 = vld [vmem:[%s1771_s1 + $0x1c0] ss:$8 sps:$4 sm:$0xff]  }
  0x11   :  { %875 = vmatprep.subr.bf16.mxu1 %v1160_v17  ;;  %v14_v46 = vld [vmem:[%s1772_s0] sm:$0xff]  ;;  %v15_v48 = vld [vmem:[%s1772_s0 + $0x8] sm:$0xff]  ;;  %v1206_v52 = vld [vmem:[%s1771_s1 + $0xb4] ss:$8 sps:$4 sm:$0xff]  }
  0x12   :  { %v999_v47 = vcombine.high %v14_v46, %v14_v46  ;;  %v1001_v51 = vcombine.high %v15_v48, %v15_v48  ;;  %v1208_v53 = vld [vmem:[%s1771_s1 + $0x1b4] ss:$8 sps:$4 sm:$0xff]   ;;  %v1210_v54 = vld [vmem:[%s1771_s1 + $0xb0] ss:$8 sps:$4 sm:$0xff]   ;;  %v1212_v56 = vld [vmem:[%s1771_s1 + $0xa4] ss:$8 sps:$4 sm:$0xff]   ;;  %v998_v6 = vcombine.low %v14_v46, %v14_v46  ;;  %v1000_v7 = vcombine.low %v15_v48, %v15_v48 }
  0x13   :  { %835 = vmatpush1.bf16.msra.mxu0 %v1162_v18  ;;  %v1211_v55 = vld [vmem:[%s1771_s1 + $0x1b0] ss:$8 sps:$4 sm:$0xff]   ;;  %v1214_v57 = vld [vmem:[%s1771_s1 + $0x1a4] ss:$8 sps:$4 sm:$0xff]   ;;  %v1216_v58 = vld [vmem:[%s1771_s1 + $0xa0] ss:$8 sps:$4 sm:$0xff]  }
  0x14   :  { %876 = vmatpush1.bf16.msra.mxu1 %v1163_v19  ;;  %836 = vmatprep.subr.bf16.mxu0 %v1164_v20  ;;  %v1217_v59 = vld [vmem:[%s1771_s1 + $0x1a0] ss:$8 sps:$4 sm:$0xff]   ;;  %v1218_v60 = vld [vmem:[%s1771_s1 + $0x94] ss:$8 sps:$4 sm:$0xff]   ;;  %v1222_v62 = vld [vmem:[%s1771_s1 + $0x90] ss:$8 sps:$4 sm:$0xff]  }
  0x15   :  { %877 = vmatprep.subr.bf16.mxu1 %v1166_v21  ;;  %858 = vmatprep.mubr.bf16.mxu0 %v999_v47  ;;  %v1220_v61 = vld [vmem:[%s1771_s1 + $0x194] ss:$8 sps:$4 sm:$0xff]   ;;  %v1223_v63 = vld [vmem:[%s1771_s1 + $0x190] ss:$8 sps:$4 sm:$0xff]   ;;  %v1224_v0 = vld [vmem:[%s1771_s1 + $0x84] ss:$8 sps:$4 sm:$0xff]  }
  0x16   :  { %899 = vmatprep.mubr.bf16.mxu1 %v1001_v51  ;;  %v1226_v1 = vld [vmem:[%s1771_s1 + $0x184] ss:$8 sps:$4 sm:$0xff]   ;;  %v1228_v2 = vld [vmem:[%s1771_s1 + $0x80] ss:$8 sps:$4 sm:$0xff]   ;;  %v1236_v4 = vld [vmem:[%s1771_s1 + $0x274] ss:$8 sps:$4 sm:$0xff]  }
  0x17   :  { %837 = vmatpush1.bf16.msra.mxu0 %v1168_v22  ;;  %v1229_v3 = vld [vmem:[%s1771_s1 + $0x180] ss:$8 sps:$4 sm:$0xff]   ;;  %v1239_v5 = vld [vmem:[%s1771_s1 + $0x374] ss:$8 sps:$4 sm:$0xff]   ;;  %v1234_v8 = vld [vmem:[%s1771_s1 + $0x270] ss:$8 sps:$4 sm:$0xff]  }
  0x18   :  { %878 = vmatpush1.bf16.msra.mxu1 %v1169_v23  ;;  %838 = vmatprep.subr.bf16.mxu0 %v1170_v24  ;;  %v1237_v9 = vld [vmem:[%s1771_s1 + $0x370] ss:$8 sps:$4 sm:$0xff]   ;;  %v1242_v10 = vld [vmem:[%s1771_s1 + $0x264] ss:$8 sps:$4 sm:$0xff]   ;;  %v1240_v12 = vld [vmem:[%s1771_s1 + $0x260] ss:$8 sps:$4 sm:$0xff]  }
  0x19   :  { %879 = vmatprep.subr.bf16.mxu1 %v1172_v25  ;;  %v1245_v11 = vld [vmem:[%s1771_s1 + $0x364] ss:$8 sps:$4 sm:$0xff]   ;;  %v1243_v13 = vld [vmem:[%s1771_s1 + $0x360] ss:$8 sps:$4 sm:$0xff]   ;;  %v1248_v14 = vld [vmem:[%s1771_s1 + $0x254] ss:$8 sps:$4 sm:$0xff]  }
  0x1a   :  { %v1251_v15 = vld [vmem:[%s1771_s1 + $0x354] ss:$8 sps:$4 sm:$0xff]   ;;  %v1246_v16 = vld [vmem:[%s1771_s1 + $0x250] ss:$8 sps:$4 sm:$0xff]   ;;  %v1254_v18 = vld [vmem:[%s1771_s1 + $0x244] ss:$8 sps:$4 sm:$0xff]  }
  0x1b   :  { %839 = vmatpush1.bf16.msra.mxu0 %v1174_v26  ;;  %v1249_v17 = vld [vmem:[%s1771_s1 + $0x350] ss:$8 sps:$4 sm:$0xff]   ;;  %v1257_v19 = vld [vmem:[%s1771_s1 + $0x344] ss:$8 sps:$4 sm:$0xff]   ;;  %v1252_v20 = vld [vmem:[%s1771_s1 + $0x240] ss:$8 sps:$4 sm:$0xff]  }
  0x1c   :  { %880 = vmatpush1.bf16.msra.mxu1 %v1175_v27  ;;  %840 = vmatprep.subr.bf16.mxu0 %v1176_v28  ;;  %v1255_v21 = vld [vmem:[%s1771_s1 + $0x340] ss:$8 sps:$4 sm:$0xff]   ;;  %v1260_v22 = vld [vmem:[%s1771_s1 + $0x234] ss:$8 sps:$4 sm:$0xff]   ;;  %v1258_v24 = vld [vmem:[%s1771_s1 + $0x230] ss:$8 sps:$4 sm:$0xff]  }
  0x1d   :  { %881 = vmatprep.subr.bf16.mxu1 %v1178_v29  ;;  %v1263_v23 = vld [vmem:[%s1771_s1 + $0x334] ss:$8 sps:$4 sm:$0xff]   ;;  %v1261_v25 = vld [vmem:[%s1771_s1 + $0x330] ss:$8 sps:$4 sm:$0xff]   ;;  %v1266_v26 = vld [vmem:[%s1771_s1 + $0x224] ss:$8 sps:$4 sm:$0xff]  }
  0x1e   :  { %v1269_v27 = vld [vmem:[%s1771_s1 + $0x324] ss:$8 sps:$4 sm:$0xff]   ;;  %v1264_v28 = vld [vmem:[%s1771_s1 + $0x220] ss:$8 sps:$4 sm:$0xff]   ;;  %v1299_v51 = vld [vmem:[%s1771_s1 + $0x3d4] ss:$8 sps:$4 sm:$0xff]  }
  0x1f   :  { %841 = vmatpush1.bf16.msra.mxu0 %v1180_v30  ;;  %v1267_v29 = vld [vmem:[%s1771_s1 + $0x320] ss:$8 sps:$4 sm:$0xff]   ;;  %v1272_v30 = vld [vmem:[%s1771_s1 + $0x214] ss:$8 sps:$4 sm:$0xff]   ;;  %v1290_v46 = vld [vmem:[%s1771_s1 + $0x2e4] ss:$8 sps:$4 sm:$0xff]  }
  0x20   :  { %882 = vmatpush1.bf16.msra.mxu1 %v1181_v31  ;;  %842 = vmatprep.subr.bf16.mxu0 %v1182_v32  ;;  %v1275_v31 = vld [vmem:[%s1771_s1 + $0x314] ss:$8 sps:$4 sm:$0xff]   ;;  %v1293_v47 = vld [vmem:[%s1771_s1 + $0x3e4] ss:$8 sps:$4 sm:$0xff]   ;;  %v1288_v48 = vld [vmem:[%s1771_s1 + $0x2e0] ss:$8 sps:$4 sm:$0xff]  }
  0x21   :  { %883 = vmatprep.subr.bf16.mxu1 %v1184_v33  ;;  %v1633_v32 = vld [vmem:[%s1772_s0 + $0x10] sm:$0xff]  ;;  %v1638_v33 = vld [vmem:[%s1772_s0 + $0x18] sm:$0xff] }
  0x23   :  { %843 = vmatpush2.bf16.msra.mxu0 %v1186_v34  ;;  %v1003_v34 = vcombine.high %v1633_v32, %v1633_v32 }
  0x24   :  { %884 = vmatpush2.bf16.msra.mxu1 %v1187_v35  ;;  %844 = vmatprep.subr.bf16.mxu0 %v1188_v36  ;;  %v1005_v35 = vcombine.high %v1638_v33, %v1638_v33  ;;  %v1270_v36 = vld [vmem:[%s1771_s1 + $0x210] ss:$8 sps:$4 sm:$0xff]  }
  0x25   :  { %885 = vmatprep.subr.bf16.mxu1 %v1190_v37  ;;  %v1273_v37 = vld [vmem:[%s1771_s1 + $0x310] ss:$8 sps:$4 sm:$0xff]  }
  0x27   :  { %845 = vmatpush2.bf16.msra.mxu0 %v1192_v38  ;;  %v1278_v38 = vld [vmem:[%s1771_s1 + $0x204] ss:$8 sps:$4 sm:$0xff]  }
  0x28   :  { %886 = vmatpush2.bf16.msra.mxu1 %v1193_v39  ;;  %846 = vmatprep.subr.bf16.mxu0 %v1194_v40  ;;  %v1281_v39 = vld [vmem:[%s1771_s1 + $0x304] ss:$8 sps:$4 sm:$0xff]   ;;  %v1276_v40 = vld [vmem:[%s1771_s1 + $0x200] ss:$8 sps:$4 sm:$0xff]  }
  0x29   :  { %887 = vmatprep.subr.bf16.mxu1 %v1196_v41  ;;  %v1279_v41 = vld [vmem:[%s1771_s1 + $0x300] ss:$8 sps:$4 sm:$0xff]  }
  0x2b   :  { %847 = vmatpush2.bf16.msra.mxu0 %v1198_v42  ;;  %v1284_v42 = vld [vmem:[%s1771_s1 + $0x2f4] ss:$8 sps:$4 sm:$0xff]  }
  0x2c   :  { %888 = vmatpush2.bf16.msra.mxu1 %v1199_v43  ;;  %848 = vmatprep.subr.bf16.mxu0 %v1200_v44  ;;  %v1287_v43 = vld [vmem:[%s1771_s1 + $0x3f4] ss:$8 sps:$4 sm:$0xff]   ;;  %v1282_v44 = vld [vmem:[%s1771_s1 + $0x2f0] ss:$8 sps:$4 sm:$0xff]  }
  0x2d   :  { %889 = vmatprep.subr.bf16.mxu1 %v1202_v45  ;;  %v1285_v45 = vld [vmem:[%s1771_s1 + $0x3f0] ss:$8 sps:$4 sm:$0xff]  }
  0x2f   :  { %849 = vmatpush2.bf16.msra.mxu0 %v1204_v49  ;;  %v1291_v49 = vld [vmem:[%s1771_s1 + $0x3e0] ss:$8 sps:$4 sm:$0xff]  }
  0x30   :  { %890 = vmatpush2.bf16.msra.mxu1 %v1205_v50  ;;  %850 = vmatprep.subr.bf16.mxu0 %v1206_v52  ;;  %v1296_v50 = vld [vmem:[%s1771_s1 + $0x2d4] ss:$8 sps:$4 sm:$0xff]   ;;  %v1294_v52 = vld [vmem:[%s1771_s1 + $0x2d0] ss:$8 sps:$4 sm:$0xff]  }
  0x31   :  { %891 = vmatprep.subr.bf16.mxu1 %v1208_v53  ;;  %v1297_v53 = vld [vmem:[%s1771_s1 + $0x3d0] ss:$8 sps:$4 sm:$0xff]  }
  0x33   :  { %851 = vmatpush2.bf16.msra.mxu0 %v1210_v54  ;;  %v1302_v54 = vld [vmem:[%s1771_s1 + $0x2c4] ss:$8 sps:$4 sm:$0xff]  }
  0x34   :  { %892 = vmatpush2.bf16.msra.mxu1 %v1211_v55  ;;  %852 = vmatprep.subr.bf16.mxu0 %v1212_v56  ;;  %v1305_v55 = vld [vmem:[%s1771_s1 + $0x3c4] ss:$8 sps:$4 sm:$0xff]   ;;  %v1300_v56 = vld [vmem:[%s1771_s1 + $0x2c0] ss:$8 sps:$4 sm:$0xff]  }
  0x35   :  { %893 = vmatprep.subr.bf16.mxu1 %v1214_v57  ;;  %v1303_v57 = vld [vmem:[%s1771_s1 + $0x3c0] ss:$8 sps:$4 sm:$0xff]  }
  0x37   :  { %853 = vmatpush2.bf16.msra.mxu0 %v1216_v58  ;;  %v1308_v58 = vld [vmem:[%s1771_s1 + $0x2b4] ss:$8 sps:$4 sm:$0xff]  }
  0x38   :  { %894 = vmatpush2.bf16.msra.mxu1 %v1217_v59  ;;  %854 = vmatprep.subr.bf16.mxu0 %v1218_v60  ;;  %v1311_v59 = vld [vmem:[%s1771_s1 + $0x3b4] ss:$8 sps:$4 sm:$0xff]   ;;  %v1306_v60 = vld [vmem:[%s1771_s1 + $0x2b0] ss:$8 sps:$4 sm:$0xff]  }
  0x39   :  { %895 = vmatprep.subr.bf16.mxu1 %v1220_v61  ;;  %v1309_v61 = vld [vmem:[%s1771_s1 + $0x3b0] ss:$8 sps:$4 sm:$0xff]  }
  0x3b   :  { %855 = vmatpush2.bf16.msra.mxu0 %v1222_v62  ;;  %v1314_v62 = vld [vmem:[%s1771_s1 + $0x2a4] ss:$8 sps:$4 sm:$0xff]  }
  0x3c   :  { %896 = vmatpush2.bf16.msra.mxu1 %v1223_v63  ;;  %856 = vmatprep.subr.bf16.mxu0 %v1224_v0  ;;  %v1317_v63 = vld [vmem:[%s1771_s1 + $0x3a4] ss:$8 sps:$4 sm:$0xff]   ;;  %v1312_v0 = vld [vmem:[%s1771_s1 + $0x2a0] ss:$8 sps:$4 sm:$0xff]  }
  0x3d   :  { %897 = vmatprep.subr.bf16.mxu1 %v1226_v1  ;;  %v1315_v1 = vld [vmem:[%s1771_s1 + $0x3a0] ss:$8 sps:$4 sm:$0xff]  }
  0x3f   :  { %857 = vmatpush2.bf16.msra.mxu0 %v1228_v2  ;;  %v1320_v2 = vld [vmem:[%s1771_s1 + $0x294] ss:$8 sps:$4 sm:$0xff]  }
  0x40   :  { %898 = vmatpush2.bf16.msra.mxu1 %v1229_v3  ;;  %908 = vmatprep.subr.bf16.mxu0 %v1236_v4  ;;  %v1323_v3 = vld [vmem:[%s1771_s1 + $0x394] ss:$8 sps:$4 sm:$0xff]   ;;  %v1318_v4 = vld [vmem:[%s1771_s1 + $0x290] ss:$8 sps:$4 sm:$0xff]  }
  0x41   :  { %949 = vmatprep.subr.bf16.mxu1 %v1239_v5  ;;  %v1321_v5 = vld [vmem:[%s1771_s1 + $0x390] ss:$8 sps:$4 sm:$0xff]  }
  0x42   :  { %859 = vmatmul.mubr.bf16.vlgmr.msra.gmra.mxu0 %v998_v6  ;;  %v1326_v6 = vld [vmem:[%s1771_s1 + $0x284] ss:$8 sps:$4 sm:$0xff]  }
  0x43   :  { %900 = vmatmul.mubr.bf16.vlgmr.msra.gmra.mxu1 %v1000_v7  ;;  %909 = vmatpush1.bf16.msra.mxu0 %v1234_v8  ;;  %v1329_v7 = vld [vmem:[%s1771_s1 + $0x384] ss:$8 sps:$4 sm:$0xff]   ;;  %v1324_v8 = vld [vmem:[%s1771_s1 + $0x280] ss:$8 sps:$4 sm:$0xff]  }
  0x44   :  { %950 = vmatpush1.bf16.msra.mxu1 %v1237_v9  ;;  %910 = vmatprep.subr.bf16.mxu0 %v1242_v10  ;;  %v1327_v9 = vld [vmem:[%s1771_s1 + $0x380] ss:$8 sps:$4 sm:$0xff]   ;;  %v1002_v10 = vcombine.low %v1633_v32, %v1633_v32 }
  0x45   :  { %951 = vmatprep.subr.bf16.mxu1 %v1245_v11  ;;  %940 = vmatprep.mubr.bf16.mxu0 %v1003_v34  ;;  %v1004_v11 = vcombine.low %v1638_v33, %v1638_v33 }
  0x46   :  { %981 = vmatprep.mubr.bf16.mxu1 %v1005_v35 }
  0x47   :  { %911 = vmatpush1.bf16.msra.mxu0 %v1240_v12 }
  0x48   :  { %952 = vmatpush1.bf16.msra.mxu1 %v1243_v13  ;;  %912 = vmatprep.subr.bf16.mxu0 %v1248_v14 }
  0x49   :  { %953 = vmatprep.subr.bf16.mxu1 %v1251_v15 }
  0x4b   :  { %913 = vmatpush1.bf16.msra.mxu0 %v1246_v16 }
  0x4c   :  { %954 = vmatpush1.bf16.msra.mxu1 %v1249_v17  ;;  %914 = vmatprep.subr.bf16.mxu0 %v1254_v18 }
  0x4d   :  { %955 = vmatprep.subr.bf16.mxu1 %v1257_v19 }
  0x4f   :  { %915 = vmatpush1.bf16.msra.mxu0 %v1252_v20  ;;  %v148_v20 = vlaneseq }
  0x50   :  { %956 = vmatpush1.bf16.msra.mxu1 %v1255_v21  ;;  %916 = vmatprep.subr.bf16.mxu0 %v1260_v22 }
  0x51   :  { %957 = vmatprep.subr.bf16.mxu1 %v1263_v23  ;;  %v149_v21 = vshrl.u32 %v148_v20, 7  ;;  %v146_v23 = vld [vmem:[%s1773_s2] sm:$0x3] }
  0x53   :  { %917 = vmatpush1.bf16.msra.mxu0 %v1258_v24  ;;  %v150_v22 = vsub.s32 0, %v149_v21  ;;  %v154_v24 = vsub.s32 1, %v149_v21 }
  0x54   :  { %958 = vmatpush1.bf16.msra.mxu1 %v1261_v25  ;;  %918 = vmatprep.subr.bf16.mxu0 %v1266_v26 }
  0x55   :  { %959 = vmatprep.subr.bf16.mxu1 %v1269_v27  ;;  %v151_v25 = vrot.slane %v146_v23, %v150_v22  ;;  %v155_v26 = vrot.slane %v146_v23, %v154_v24 }
  0x57   :  { %919 = vmatpush1.bf16.msra.mxu0 %v1264_v28 }
  0x58   :  { %960 = vmatpush1.bf16.msra.mxu1 %v1267_v29  ;;  %920 = vmatprep.subr.bf16.mxu0 %v1272_v30 }
  0x59   :  { %961 = vmatprep.subr.bf16.mxu1 %v1275_v31 }
  0x5b   :  { %921 = vmatpush1.bf16.msra.mxu0 %v1270_v36 }
  0x5c   :  { %962 = vmatpush1.bf16.msra.mxu1 %v1273_v37  ;;  %922 = vmatprep.subr.bf16.mxu0 %v1278_v38 }
  0x5d   :  { %963 = vmatprep.subr.bf16.mxu1 %v1281_v39 }
  0x5f   :  { %923 = vmatpush1.bf16.msra.mxu0 %v1276_v40 }
  0x60   :  { %964 = vmatpush1.bf16.msra.mxu1 %v1279_v41  ;;  %924 = vmatprep.subr.bf16.mxu0 %v1284_v42 }
  0x61   :  { %965 = vmatprep.subr.bf16.mxu1 %v1287_v43 }
  0x63   :  { %925 = vmatpush2.bf16.msra.mxu0 %v1282_v44 }
  0x64   :  { %966 = vmatpush2.bf16.msra.mxu1 %v1285_v45  ;;  %926 = vmatprep.subr.bf16.mxu0 %v1290_v46 }
  0x65   :  { %967 = vmatprep.subr.bf16.mxu1 %v1293_v47 }
  0x67   :  { %927 = vmatpush2.bf16.msra.mxu0 %v1288_v48 }
  0x68   :  { %968 = vmatpush2.bf16.msra.mxu1 %v1291_v49  ;;  %928 = vmatprep.subr.bf16.mxu0 %v1296_v50 }
  0x69   :  { %969 = vmatprep.subr.bf16.mxu1 %v1299_v51 }
  0x6b   :  { %929 = vmatpush2.bf16.msra.mxu0 %v1294_v52 }
  0x6c   :  { %970 = vmatpush2.bf16.msra.mxu1 %v1297_v53  ;;  %930 = vmatprep.subr.bf16.mxu0 %v1302_v54 }
  0x6d   :  { %971 = vmatprep.subr.bf16.mxu1 %v1305_v55 }
  0x6f   :  { %931 = vmatpush2.bf16.msra.mxu0 %v1300_v56 }
  0x70   :  { %972 = vmatpush2.bf16.msra.mxu1 %v1303_v57  ;;  %932 = vmatprep.subr.bf16.mxu0 %v1308_v58 }
  0x71   :  { %973 = vmatprep.subr.bf16.mxu1 %v1311_v59 }
  0x73   :  { %933 = vmatpush2.bf16.msra.mxu0 %v1306_v60 }
  0x74   :  { %974 = vmatpush2.bf16.msra.mxu1 %v1309_v61  ;;  %934 = vmatprep.subr.bf16.mxu0 %v1314_v62 }
  0x75   :  { %975 = vmatprep.subr.bf16.mxu1 %v1317_v63 }
  0x77   :  { %935 = vmatpush2.bf16.msra.mxu0 %v1312_v0 }
  0x78   :  { %976 = vmatpush2.bf16.msra.mxu1 %v1315_v1  ;;  %936 = vmatprep.subr.bf16.mxu0 %v1320_v2 }
  0x79   :  { %977 = vmatprep.subr.bf16.mxu1 %v1323_v3 }
  0x7b   :  { %937 = vmatpush2.bf16.msra.mxu0 %v1318_v4 }
  0x7c   :  { %978 = vmatpush2.bf16.msra.mxu1 %v1321_v5  ;;  %938 = vmatprep.subr.bf16.mxu0 %v1326_v6 }
  0x7d   :  { %979 = vmatprep.subr.bf16.mxu1 %v1329_v7 }
  0x7f   :  { %939 = vmatpush2.bf16.msra.mxu0 %v1324_v8 }
  0x80   :  { %980 = vmatpush2.bf16.msra.mxu1 %v1327_v9 }
  0x82   :  { %941 = vmatmul.mubr.bf16.vlgmr.msra.gmra.mxu0 %v1002_v10 }
  0x83   :  { %982 = vmatmul.mubr.bf16.vlgmr.msra.gmra.mxu1 %v1004_v11 }
 0x102   :  { %v860_v12 = vpop.f32.mrf.mxu0 }
 0x103   :  { %v901_v13 = vpop.f32.mrf.mxu1  ;;  %v861_v27 = vadd.f32 %v860_v12, %v151_v25 }
 0x104   :  { %v862_v14 = vpop.f32.mrf.mxu0 }
 0x105   :  { %v903_v15 = vpop.f32.mrf.mxu1  ;;  %v863_v28 = vadd.f32 %v862_v14, %v155_v26  ;;  %v902_v29 = vadd.f32 %v901_v13, %v861_v27 }
 0x106   :  { %v864_v16 = vpop.f32.mrf.mxu0 }
 0x107   :  { %v905_v17 = vpop.f32.mrf.mxu1  ;;  %v904_v32 = vadd.f32 %v903_v15, %v863_v28 }
 0x108   :  { %v865_v18 = vpop.f32.mrf.mxu0 }
 0x109   :  { %v906_v19 = vpop.f32.mrf.mxu1 }
 0x142   :  { %v942_v30 = vpop.f32.mrf.mxu0 }
 0x143   :  { %v983_v31 = vpop.f32.mrf.mxu1  ;;  %v943_v33 = vadd.f32 %v942_v30, %v902_v29 }
 0x144   :  { %v944_v34 = vpop.f32.mrf.mxu0 }
 0x145   :  { %v985_v35 = vpop.f32.mrf.mxu1  ;;  %v984_v36 = vadd.f32 %v983_v31, %v943_v33  ;;  %v945_v37 = vadd.f32 %v944_v34, %v904_v32 }
 0x146   :  { %v946_v38 = vpop.f32.mrf.mxu0 }
 0x147   :  { %v987_v39 = vpop.f32.mrf.mxu1  ;;  %v990_v40 = vmax.f32 %v984_v36, 0.0  ;;  %v986_v41 = vadd.f32 %v985_v35, %v945_v37 }
 0x148   :  { %v947_v42 = vpop.f32.mrf.mxu0 }
 0x149   :  { %v988_v43 = vpop.f32.mrf.mxu1  ;;  %992 = vst [vmem:[%s1774_s3] sm:$0xff] %v990_v40  ;;  %v991_v44 = vmax.f32 %v986_v41, 0.0 }
 0x14b   :  { %993 = vst [vmem:[%s1774_s3 + $0x8] sm:$0xff] %v991_v44 }

</bundles_post_ra>
